<compile_context>
chip_gen: v5e
topology: v5e:2x2
jax: 0.10.0
libtpu: 0.0.40
codegen_flags: <defaults>
</compile_context>

<pallas_src>
import functools

import jax
import jax.numpy as jnp
from jax.experimental import pallas as pl
from jax.experimental.pallas import tpu as pltpu

ALPHA = 0.2          # LeakyReLU negative slope
DROPOUT = 0.5        # unused at inference
NEG_INF = -1e30      # finite mask sentinel (exp underflows to exactly 0)
# TODO(synk): dropout omitted (eval-mode forward); training-mode parity would draw
#             the dropout mask with pltpu.prng_seed / pltpu.prng_random_bits.


def _attn_pred_kernel(nodes_ref, adj_ref, waug_ref, out_ref, attn_ref,
                      *, f_out, alpha, mxu_dtype):
    """One grid step = G graphs stacked into (G*N, .) slabs + block-diag adjacency."""
    gn = adj_ref.shape[0]                                       # G * N

    # ---- one stacked feature+score matmul: [node_fts | <x,W a1> | <x,W a2>] ----
    res = jnp.dot(nodes_ref[...], waug_ref[...],
                  preferred_element_type=jnp.float32)           # (GN, F_out+2)
    node_fts = res[:, :f_out]                                   # (GN, F_out)
    e1 = res[:, f_out:f_out + 1]                                # (GN, 1)
    e2 = res[:, f_out + 1:f_out + 2]                            # (GN, 1)

    adj = adj_ref[...]                                          # (GN, GN) 0/1 bf16

    # raw[i, j] = e1_i + e2_j on the whole stacked block; off-block entries are
    # garbage but adj_bd == 0 there so they get masked below.
    e2_t = jnp.transpose(jnp.broadcast_to(e2, (gn, gn)))        # square XLU transpose
    raw = e1 + e2_t
    logits = jnp.where(raw > 0, raw, alpha * raw)               # LeakyReLU

    # adj @ logits: one (GN x GN x GN) MXU pass (block-diag == per-graph matmuls).
    logits = jnp.dot(adj.astype(mxu_dtype), logits.astype(mxu_dtype),
                     preferred_element_type=jnp.float32)
    masked = jnp.where(adj < 0.5, NEG_INF, logits)

    # Row softmax over the stacked row; masked lanes (off-block or no-edge)
    # underflow to exactly 0, so this equals the per-graph softmax.
    row_max = jnp.max(masked, axis=1, keepdims=True)
    ex = jnp.exp(masked - row_max)
    denom = jnp.sum(ex, axis=1, keepdims=True)
    attention = ex * pl.reciprocal(denom)                       # exact: rows sum to 1

    attn_ref[...] = attention                                   # mirrors self.f_attn
    out = jnp.dot(attention.astype(mxu_dtype), node_fts.astype(mxu_dtype),
                  preferred_element_type=jnp.float32)           # one MXU pass
    out_ref[...] = jnp.where(out > 0, out, alpha * out)


def _step_vmem_bytes(gn, f_in, f_out, op_bytes):
    """Rough per-step VMEM need: double-buffered ins/outs + f32 intermediates."""
    ins = gn * f_in * op_bytes + gn * gn * 2 + f_in * (f_out + 2) * op_bytes
    outs = gn * f_out * 4 + gn * gn * 4
    interm = 6 * gn * gn * 4
    return 2 * (ins + outs) + interm


def attn_pred(nodes, adj, w, a1, a2, *, alpha=ALPHA, mxu_dtype=jnp.float32,
              graphs_per_step=None):
    """Batched AttnPred forward. Returns (LeakyReLU(attn @ node_fts), attention)."""
    b, n, f_in = nodes.shape
    f_out = w.shape[1]
    op_bytes = jnp.dtype(mxu_dtype).itemsize

    # ---- pick G graphs per grid step ----------------------------------------
    # Target G*N ~ 128 (fill the MXU M dim / lane dim of the block-diag slab),
    # capped by a VMEM budget that is safe on every generation (v7x: 64 MiB
    # physical, 32 MiB default-scoped, vs 128 MiB on v5e / v6e).
    if graphs_per_step is None:
        G = max(1, min(b, pl.cdiv(128, n)))
        while G > 1 and _step_vmem_bytes(G * n, f_in, f_out, op_bytes) > 8 * 2**20:
            G -= 1
    else:
        G = max(1, graphs_per_step)
    while (G * n) % 16:          # keep the stacked row count sublane-tile aligned
        G += 1
    gn = G * n

    b_pad = pl.cdiv(b, G) * G    # pad the batch instead of degrading G (odd / prime B)
    steps = b_pad // G
    if b_pad != b:
        nodes = jnp.pad(nodes, ((0, b_pad - b), (0, 0), (0, 0)))
        adj = jnp.pad(adj, ((0, b_pad - b), (0, 0), (0, 0)))

    # ---- host-side (tiny) parameter / layout prep ----------------------------
    # Fold the attention vector into W: res = nodes @ [W | W@a1 | W@a2].
    w_aug = jnp.concatenate([w, w @ a1, w @ a2], axis=1).astype(mxu_dtype)  # (F_in, F_out+2)
    nodes2d = nodes.reshape(b_pad * n, f_in).astype(mxu_dtype)              # lane-dense slab

    # Block-diagonal adjacency, one (G*N, G*N) block per grid step, flattened to a
    # lane-dense 2-D slab. 0/1 is exact in bf16 -> half the adjacency DMA bytes.
    adj_bd = (adj.reshape(steps, G, n, 1, n) *
              jnp.eye(G, dtype=adj.dtype).reshape(1, G, 1, G, 1))
    adj_bd = adj_bd.reshape(b_pad * n, gn).astype(jnp.bfloat16)

    est = _step_vmem_bytes(gn, f_in, f_out, op_bytes)
    vmem_limit = int(min(32 * 2**20, max(16 * 2**20, 2 * est)))

    kernel = functools.partial(_attn_pred_kernel, f_out=f_out, alpha=alpha,
                               mxu_dtype=mxu_dtype)

    out2d, attn2d = pl.pallas_call(
        kernel,
        out_shape=(
            jax.ShapeDtypeStruct((b_pad * n, f_out), jnp.float32),
            jax.ShapeDtypeStruct((b_pad * n, gn), jnp.float32),
        ),
        grid=(steps,),
        in_specs=[
            pl.BlockSpec((gn, f_in), lambda i: (i, 0)),          # stacked node features
            pl.BlockSpec((gn, gn), lambda i: (i, 0)),            # block-diag adjacency
            pl.BlockSpec((f_in, f_out + 2), lambda i: (0, 0)),   # augmented weight (shared)
        ],
        out_specs=(
            pl.BlockSpec((gn, f_out), lambda i: (i, 0)),         # LeakyReLU(attn @ node_fts)
            pl.BlockSpec((gn, gn), lambda i: (i, 0)),            # per-step attention block
        ),
        compiler_params=pltpu.CompilerParams(
            dimension_semantics=("parallel",),
            vmem_limit_bytes=vmem_limit,
        ),
    )(nodes2d, adj_bd, w_aug)

    # ---- unpack: drop batch padding, strip off-diagonal attention blocks -----
    out = out2d.reshape(b_pad, n, f_out)[:b]
    attn = attn2d.reshape(steps, G, n, G, n)
    attn = jnp.moveaxis(jnp.diagonal(attn, axis1=1, axis2=3), -1, 1)  # (steps, G, n, n)
    attn = attn.reshape(b_pad, n, n)[:b]
    return out, attn


def _reference(nodes, adj, w, a1, a2, alpha=ALPHA):
    """Pure-JAX reference matching the PyTorch forward (eval mode), batched."""
    node_fts = nodes @ w
    raw = (node_fts @ a1) + jnp.swapaxes(node_fts @ a2, -1, -2)
    logits = jnp.where(raw > 0, raw, alpha * raw)
    logits = adj @ logits
    masked = jnp.where(adj < 0.5, -jnp.inf, logits)
    attn = jax.nn.softmax(masked, axis=-1)
    out = attn @ node_fts
    return jnp.where(out > 0, out, alpha * out), attn


if __name__ == "__main__":
    B, N, F_IN, F_OUT = 32, 8, 16, 32

    key = jax.random.PRNGKey(0)
    k_nodes, k_adj, k_w, k_a = jax.random.split(key, 4)

    nodes = jax.random.normal(k_nodes, (B, N, F_IN), dtype=jnp.float32)

    # deterministic binary adjacency with self-loops (reference has no empty-row guard)
    adj = (jax.random.uniform(k_adj, (B, N, N)) > 0.5).astype(jnp.float32)
    adj = jnp.maximum(adj, jnp.eye(N, dtype=jnp.float32)[None])

    # parameters (torch: W = Linear(F_IN, F_OUT, bias=False), a = Linear(2*F_OUT, 1, bias=False))
    w = jax.random.normal(k_w, (F_IN, F_OUT), dtype=jnp.float32) * 0.1
    a_vec = jax.random.normal(k_a, (2 * F_OUT,), dtype=jnp.float32) * 0.1
    a1 = a_vec[:F_OUT].reshape(F_OUT, 1)
    a2 = a_vec[F_OUT:].reshape(F_OUT, 1)

    ref_out, ref_attn = _reference(nodes, adj, w, a1, a2)

    # f32 operands.  Tolerance is conservative because f32 MXU matmuls may be
    # emulated with bf16 passes depending on generation / default precision.
    out, attn = attn_pred(nodes, adj, w, a1, a2)
    jax.block_until_ready((out, attn))
    assert out.shape == ref_out.shape and attn.shape == ref_attn.shape
    assert jnp.allclose(out, ref_out, atol=2e-2, rtol=2e-2)
    assert jnp.allclose(attn, ref_attn, atol=2e-2, rtol=2e-2)

    # bf16 MXU operands for all matmuls (native dtype on v5e / v6e / v7x).
    out_bf, attn_bf = attn_pred(nodes, adj, w, a1, a2, mxu_dtype=jnp.bfloat16)
    jax.block_until_ready((out_bf, attn_bf))
    assert jnp.allclose(out_bf, ref_out, atol=6e-2, rtol=6e-2)
    assert jnp.allclose(attn_bf, ref_attn, atol=6e-2, rtol=6e-2)

    print("KERNEL_OK")
</pallas_src>

<mosaic_0001>
module attributes {stable_mosaic.version = 11 : i64} {
  func.func @_attn_pred_kernel(%arg0: i32, %arg1: memref<128x16xf32, #tpu.memory_space<vmem>>, %arg2: memref<128x128xbf16, #tpu.memory_space<vmem>>, %arg3: memref<16x34xf32, #tpu.memory_space<vmem>>, %arg4: memref<128x32xf32, #tpu.memory_space<vmem>>, %arg5: memref<128x128xf32, #tpu.memory_space<vmem>>) attributes {dimension_semantics = [#tpu.dimension_semantics<parallel>], iteration_bounds = array<i64: 2>, scalar_prefetch = 0 : i64, scratch_operands = 0 : i64, tpu.core_type = #tpu.core_type<tc>, window_params = [{transform_indices = @transform_0, window_bounds = array<i64: 128, 16>}, {transform_indices = @transform_1, window_bounds = array<i64: 128, 128>}, {pipeline_mode = #tpu.pipeline_mode<synchronous>, transform_indices = @transform_2, window_bounds = array<i64: 16, 34>}, {transform_indices = @transform_3, window_bounds = array<i64: 128, 32>}, {transform_indices = @transform_4, window_bounds = array<i64: 128, 128>}]} {
    %c0 = arith.constant 0 : index
    %c0_0 = arith.constant 0 : index
    %0 = vector.load %arg1[%c0, %c0_0] : memref<128x16xf32, #tpu.memory_space<vmem>>, vector<128x16xf32>
    %c0_1 = arith.constant 0 : index
    %c0_2 = arith.constant 0 : index
    %1 = vector.load %arg3[%c0_1, %c0_2] : memref<16x34xf32, #tpu.memory_space<vmem>>, vector<16x34xf32>
    %cst = arith.constant dense<0.000000e+00> : vector<128x34xf32>
    %2 = tpu.matmul %0, %1, %cst {dimension_numbers = #tpu.dot_dimension_numbers<[1], [0], [0], [1], [0, 0, 1, 1], [], []>} : vector<128x16xf32>, vector<16x34xf32>, vector<128x34xf32> -> vector<128x34xf32>
    %3 = vector.extract_strided_slice %2 {offsets = [0, 0], sizes = [128, 32], strides = [1, 1]} : vector<128x34xf32> to vector<128x32xf32>
    %4 = vector.extract_strided_slice %2 {offsets = [0, 32], sizes = [128, 1], strides = [1, 1]} : vector<128x34xf32> to vector<128x1xf32>
    %5 = vector.extract_strided_slice %2 {offsets = [0, 33], sizes = [128, 1], strides = [1, 1]} : vector<128x34xf32> to vector<128x1xf32>
    %c0_3 = arith.constant 0 : index
    %c0_4 = arith.constant 0 : index
    %6 = vector.load %arg2[%c0_3, %c0_4] : memref<128x128xbf16, #tpu.memory_space<vmem>>, vector<128x128xbf16>
    %7 = vector.shape_cast %5 : vector<128x1xf32> to vector<128x1xf32>
    %8 = vector.broadcast %7 : vector<128x1xf32> to vector<128x128xf32>
    %9 = tpu.transpose %8, [1, 0] : vector<128x128xf32> -> vector<128x128xf32>
    %10 = vector.broadcast %4 : vector<128x1xf32> to vector<128x128xf32>
    %11 = arith.addf %10, %9 : vector<128x128xf32>
    %cst_5 = arith.constant 0.000000e+00 : f32
    %12 = vector.broadcast %cst_5 : f32 to vector<128x128xf32>
    %13 = arith.cmpf ogt, %11, %12 : vector<128x128xf32>
    %cst_6 = arith.constant 2.000000e-01 : f32
    %14 = vector.broadcast %cst_6 : f32 to vector<128x128xf32>
    %15 = arith.mulf %14, %11 : vector<128x128xf32>
    %16 = arith.select %13, %11, %15 : vector<128x128xi1>, vector<128x128xf32>
    %17 = arith.extf %6 : vector<128x128xbf16> to vector<128x128xf32>
    %cst_7 = arith.constant dense<0.000000e+00> : vector<128x128xf32>
    %18 = tpu.matmul %17, %16, %cst_7 {dimension_numbers = #tpu.dot_dimension_numbers<[1], [0], [0], [1], [0, 0, 1, 1], [], []>} : vector<128x128xf32>, vector<128x128xf32>, vector<128x128xf32> -> vector<128x128xf32>
    %cst_8 = arith.constant 5.000000e-01 : bf16
    %19 = vector.broadcast %cst_8 : bf16 to vector<128x128xbf16>
    %20 = arith.cmpf olt, %6, %19 : vector<128x128xbf16>
    %cst_9 = arith.constant -1.000000e+30 : f32
    %21 = vector.broadcast %cst_9 : f32 to vector<128x128xf32>
    %22 = arith.select %20, %21, %18 : vector<128x128xi1>, vector<128x128xf32>
    %cst_10 = arith.constant dense<0xFF800000> : vector<128xf32>
    %23 = vector.multi_reduction <maximumf>, %22, %cst_10 [1] : vector<128x128xf32> to vector<128xf32>
    %24 = vector.shape_cast %23 : vector<128xf32> to vector<128x1xf32>
    %25 = vector.broadcast %24 : vector<128x1xf32> to vector<128x128xf32>
    %26 = arith.subf %22, %25 : vector<128x128xf32>
    %27 = math.exp %26 : vector<128x128xf32>
    %cst_11 = arith.constant dense<0.000000e+00> : vector<128xf32>
    %28 = vector.multi_reduction <add>, %27, %cst_11 [1] : vector<128x128xf32> to vector<128xf32>
    %29 = vector.shape_cast %28 : vector<128xf32> to vector<128x1xf32>
    %30 = tpu.reciprocal %29 : vector<128x1xf32> -> vector<128x1xf32>
    %31 = vector.broadcast %30 : vector<128x1xf32> to vector<128x128xf32>
    %32 = arith.mulf %27, %31 : vector<128x128xf32>
    %c0_12 = arith.constant 0 : index
    %c0_13 = arith.constant 0 : index
    %33 = vector.load %arg5[%c0_12, %c0_13] : memref<128x128xf32, #tpu.memory_space<vmem>>, vector<128x128xf32>
    tpu.vector_store %arg5[%c0_12, %c0_13], %32 {strides = array<i32>} : memref<128x128xf32, #tpu.memory_space<vmem>>, vector<128x128xf32>,
    %cst_14 = arith.constant dense<0.000000e+00> : vector<128x32xf32>
    %34 = tpu.matmul %32, %3, %cst_14 {dimension_numbers = #tpu.dot_dimension_numbers<[1], [0], [0], [1], [0, 0, 1, 1], [], []>} : vector<128x128xf32>, vector<128x32xf32>, vector<128x32xf32> -> vector<128x32xf32>
    %cst_15 = arith.constant 0.000000e+00 : f32
    %35 = vector.broadcast %cst_15 : f32 to vector<128x32xf32>
    %36 = arith.cmpf ogt, %34, %35 : vector<128x32xf32>
    %cst_16 = arith.constant 2.000000e-01 : f32
    %37 = vector.broadcast %cst_16 : f32 to vector<128x32xf32>
    %38 = arith.mulf %37, %34 : vector<128x32xf32>
    %39 = arith.select %36, %34, %38 : vector<128x32xi1>, vector<128x32xf32>
    %c0_17 = arith.constant 0 : index
    %c0_18 = arith.constant 0 : index
    %40 = vector.load %arg4[%c0_17, %c0_18] : memref<128x32xf32, #tpu.memory_space<vmem>>, vector<128x32xf32>
    tpu.vector_store %arg4[%c0_17, %c0_18], %39 {strides = array<i32>} : memref<128x32xf32, #tpu.memory_space<vmem>>, vector<128x32xf32>,
    return
  }
  func.func @transform_0(%arg0: i32) -> (i32, i32) {
    %c0_i32 = arith.constant 0 : i32
    %c0_i32_0 = arith.constant 0 : i32
    return %arg0, %c0_i32 : i32, i32
  }
  func.func @transform_1(%arg0: i32) -> (i32, i32) {
    %c0_i32 = arith.constant 0 : i32
    %c0_i32_0 = arith.constant 0 : i32
    return %arg0, %c0_i32 : i32, i32
  }
  func.func @transform_2(%arg0: i32) -> (i32, i32) {
    %c0_i32 = arith.constant 0 : i32
    %c0_i32_0 = arith.constant 0 : i32
    %c0_i32_1 = arith.constant 0 : i32
    return %c0_i32, %c0_i32_0 : i32, i32
  }
  func.func @transform_3(%arg0: i32) -> (i32, i32) {
    %c0_i32 = arith.constant 0 : i32
    %c0_i32_0 = arith.constant 0 : i32
    return %arg0, %c0_i32 : i32, i32
  }
  func.func @transform_4(%arg0: i32) -> (i32, i32) {
    %c0_i32 = arith.constant 0 : i32
    %c0_i32_0 = arith.constant 0 : i32
    return %arg0, %c0_i32 : i32, i32
  }
}

</mosaic_0001>

<bundles_post_ra>
// kernel: tpu_custom_call.1
= control target key start
LH: loop header
LB: loop body
LE: loop exit
PB: predicated region body
PF: predicated region fallthrough
CT: control target
= control target key end

     0   :  { %10 = vsyncpa [#allocation3], 0  ;;  %s2162_s0 = inlined_call_operand.vmem [shape: f32[256,16], index: 0, kind: input, shape index: {}]   ;;  %s2163_s1 = inlined_call_operand.vmem [shape: bf16[256,128], index: 1, kind: input, shape index: {}]   ;;  %s2164_s2 = inlined_call_operand.vmem [shape: f32[16,34], index: 2, kind: input, shape index: {}]   ;;  %s2165_s3 = inlined_call_operand.vmem [shape: f32[256,32], index: 3, kind: output, shape index: {0}]   ;;  %s2166_s4 = inlined_call_operand.hbm [shape: f32[256,128], index: 4, kind: output, shape index: {1}]  }
   0x1   :  { %12 = vsyncpa [#allocation3 + $0x1], 0  ;;  %s1667_s15 = smov 0   ;;  %s1669_s16 = smov 0  }
   0x2   :  { %s1671_s17 = smov 0   ;;  %s1673_s18 = smov 0  }
   0x3 LB: > { %s1688_s19 = sadd.s32 4294967295, %s1636_s18   ;;  %s1358_s20 = sadd.s32 4294967294, %s1636_s18   ;;  %s1636_s18 = sphi %s1673_s18, %s2174_s18   ;;  %s1632_s17 = sphi %s1671_s17, %s2173_s17   ;;  %s1628_s16 = sphi %s1669_s16, %s2172_s16   ;;  %s1624_s15 = sphi %s1667_s15, %s2171_s15  }
   0x4   : > { %s1692_s21 = sadd.s32 1, %s1636_s18   ;;  %s124_s22 = sadd.s32 1, %s1632_s17 }
   0x5   : > { %s121_s23 = ssub.s32 %s1636_s18, %s1692_s21  ;;  %p134_p0 = scmp.ne.s32.totalorder %s1632_s17, %s1628_s16 }
   0x6   : > { %p122_p1 = scmp.eq.s32.totalorder %s121_s23, 0  ;;  %p135_p2 = scmp.eq.s32.totalorder %s1688_s19, 1 }
   0x7   : > { %p140_p3 = scmp.ne.s32.totalorder %s1628_s16, %s1624_s15  ;;  %p141_p4 = scmp.eq.s32.totalorder %s1358_s20, 1 }
   0x8   : > { %s1703_s24 = scalar_select %p122_p1, %s1632_s17, %s124_s22  }
   0x9   : > { %p1705_p5 = por %p135_p2, %p134_p0  ;;  %p1709_p6 = por %p141_p4, %p140_p3 }
   0xa   : > { %p1361_p7 = scmp.ge.s32.totalorder %s1636_s18, 1  ;;  %p180_p8 = scmp.lt.s32.totalorder %s1636_s18, 3 }
   0xc   : > { %p181_p9 = pnand %p1361_p7, %p180_p8 }
   0xd   : > { %s1363_s5 = sshll.u32 (!%p181_p9), %s1688_s19, 4  ;;  %s213_s14 = sand.u32 (!%p181_p9), 1, %s1628_s16  }
   0xe   : > { %184 = sbr.rel (%p181_p9) target bundleno = 1320 (0x528), region = 32  ;;  %p217_p10 = scmp.lt.s32.totalorder (!%p181_p9), %s1363_s5, 31 }
   0xf   : > { %s1362_s20 = sshll.u32 (!%p181_p9), %s213_s14, 7  ;;  %s1390_s29 = sshll.u32 (!%p181_p9), %s1688_s19, 7 }
  0x10   : > { %s2017_s22 = scalar_lea.vmem (!%p181_p9), [#allocation2], %s1362_s20 }
  0x11   : > { %s1256_s7 = sshll.u32 (!%p181_p9), %s2017_s22, 4  ;;  %s1257_s7 = int_to_ptr.vmem [resolvable:$true] %s1256_s7 }
  0x13   : > { %v252_v0 = vld [vmem:[%s2164_s2 + $0x8] sm:$0xff]  ;;  %v251_v1 = vld [vmem:[%s2164_s2] sm:$0xff]  ;;  %s2176_s5 = smov (!%p217_p10, %s1363_s5), 31  ;;  %vm253_vm0 = vcmask 130048   ;;  %v1638_v14 = vmov 33   ;;  %v1639_v35 = vmov 32  }
  0x14   : > { %316 = vmatpush.msra.mxu0 %v252_v0  ;;  %s1364_s6 = sshll.u32 %s2176_s5, 3  ;;  %1505 = vset.pattern.permute.xlu0 %v1638_v14  ;;  %s1366_s10 = sshll.u32 %s2176_s5, 2 }
  0x15   : > { %s1730_s9 = scalar_lea.vmem %s2162_s0, %s1364_s6  ;;  %1506 = vset.pattern.permute.xlu1 %v1638_v14  ;;  %1507 = vset.pattern.permute.xlu2 %v1638_v14  ;;  %s1866_s13 = scalar_lea.vmem %s2163_s1, %s1366_s10 }
  0x16   : > { %317 = vmatpush.msra.mxu0 %v251_v1  ;;  %v235_v2 = vld [vmem:[%s1730_s9] sm:$0xff]  ;;  %v236_v3 = vld [vmem:[%s1730_s9 + $0x8] sm:$0xff]  ;;  %v237_v4 = vld [vmem:[%s1730_s9 + $0x10] sm:$0xff]  ;;  %s2064_s28 = scalar_lea.vmem %s2165_s3, %s1364_s6  ;;  %s1255_s6 = scalar_lea.hbm %s2166_s4, %s1390_s29 }
  0x17   : > { %1369 = vmatmul.msk.f32.vlgmr.msra.gmra.mxu0 %vm253_vm0, %v235_v2  ;;  %v238_v5 = vld [vmem:[%s1730_s9 + $0x18] sm:$0xff]  ;;  %v239_v6 = vld [vmem:[%s1730_s9 + $0x20] sm:$0xff]  ;;  %v240_v7 = vld [vmem:[%s1730_s9 + $0x28] sm:$0xff]  ;;  %s1258_s8 = sshll.u32 %s1255_s6, 4  ;;  %s1259_s8 = int_to_ptr.hbm [resolvable:$true] %s1258_s8 }
  0x18   : > { %v241_v8 = vld [vmem:[%s1730_s9 + $0x30] sm:$0xff]  ;;  %v242_v9 = vld [vmem:[%s1730_s9 + $0x38] sm:$0xff]  ;;  %v243_v10 = vld [vmem:[%s1730_s9 + $0x40] sm:$0xff]  ;;  %s1588_s10 = sshra.s32 %s1259_s8, 4  ;;  %s1589_s10 = int_to_ptr.hbm [resolvable:$true] %s1588_s10 }
  0x19   : > { %v244_v11 = vld [vmem:[%s1730_s9 + $0x48] sm:$0xff]  ;;  %v245_v12 = vld [vmem:[%s1730_s9 + $0x50] sm:$0xff]  ;;  %v246_v13 = vld [vmem:[%s1730_s9 + $0x58] sm:$0xff]  ;;  %s1590_s11 = scalar_lea.hbm %s1589_s10, 128  ;;  %p1595_p0 = scmp.lt.s32.totalorder %s1589_s10, %s2166_s4 }
  0x1a   : > { %v247_v15 = vld [vmem:[%s1730_s9 + $0x60] sm:$0xff]  ;;  %v248_v16 = vld [vmem:[%s1730_s9 + $0x68] sm:$0xff]  ;;  %v249_v17 = vld [vmem:[%s1730_s9 + $0x70] sm:$0xff]  ;;  %p1591_p11 = scmp.ne.s32.totalorder %s1589_s10, %s1590_s11 }
  0x1b   : > { %v250_v18 = vld [vmem:[%s1730_s9 + $0x78] sm:$0xff]  ;;  %s1240_s9 = scalar_lea.sflag [#allocation3], %s213_s14 }
  0x1c   : > { %p1592_p12 = pnand %p1591_p11, %p1705_p5 }
  0x1e   : > { %p1593_p13 = pneg %p1592_p12 }
  0x1f   : > { %1370 = vmatmul.msk.f32.gmra.mxu0 %vm253_vm0, %v236_v3 }
  0x27   : > { %1371 = vmatmul.msk.f32.gmra.mxu0 %vm253_vm0, %v237_v4 }
  0x2f   : > { %1372 = vmatmul.msk.f32.gmra.mxu0 %vm253_vm0, %v238_v5 }
  0x37   : > { %1373 = vmatmul.msk.f32.gmra.mxu0 %vm253_vm0, %v239_v6 }
  0x3f   : > { %1374 = vmatmul.msk.f32.gmra.mxu0 %vm253_vm0, %v240_v7 }
  0x47   : > { %1375 = vmatmul.msk.f32.gmra.mxu0 %vm253_vm0, %v241_v8 }
  0x4f   : > { %1376 = vmatmul.msk.f32.gmra.mxu0 %vm253_vm0, %v242_v9 }
  0x57   : > { %1377 = vmatmul.msk.f32.gmra.mxu0 %vm253_vm0, %v243_v10 }
  0x5f   : > { %1378 = vmatmul.msk.f32.gmra.mxu0 %vm253_vm0, %v244_v11 }
  0x67   : > { %1379 = vmatmul.msk.f32.gmra.mxu0 %vm253_vm0, %v245_v12 }
  0x6f   : > { %1380 = vmatmul.msk.f32.gmra.mxu0 %vm253_vm0, %v246_v13 }
  0x77   : > { %1381 = vmatmul.msk.f32.gmra.mxu0 %vm253_vm0, %v247_v15 }
  0x7f   : > { %1382 = vmatmul.msk.f32.gmra.mxu0 %vm253_vm0, %v248_v16 }
  0x87   : > { %1383 = vmatmul.msk.f32.gmra.mxu0 %vm253_vm0, %v249_v17 }
  0x8f   : > { %1384 = vmatmul.msk.f32.gmra.mxu0 %vm253_vm0, %v250_v18 }
  0x94   : > { %v1764_v19 = vpop.f32.mrf.mxu0 }
  0x95   : > { %385 = vperm.xlu0 %1505, %v1764_v19  }
  0x9c   : > { %v1767_v20 = vpop.f32.mrf.mxu0 }
  0x9d   : > { %390 = vperm.xlu0 %1505, %v1767_v20  }
  0xa4   : > { %v1770_v21 = vpop.f32.mrf.mxu0 }
  0xa5   : > { %395 = vperm.xlu1 %1506, %v1770_v21  }
  0xac   : > { %v1773_v22 = vpop.f32.mrf.mxu0 }
  0xad   : > { %400 = vperm.xlu1 %1506, %v1773_v22  }
  0xb4   : > { %v1776_v23 = vpop.f32.mrf.mxu0 }
  0xb5   : > { %405 = vperm.xlu2 %1507, %v1776_v23  }
  0xbc   : > { %v1779_v24 = vpop.f32.mrf.mxu0 }
  0xbd   : > { %410 = vperm.xlu2 %1507, %v1779_v24  }
  0xc4   : > { %v1782_v25 = vpop.f32.mrf.mxu0 }
  0xc5   : > { %415 = vperm.xlu0 %1505, %v1782_v25  }
  0xcc   : > { %v1785_v26 = vpop.f32.mrf.mxu0 }
  0xcd   : > { %420 = vperm.xlu1 %1506, %v1785_v26  }
  0xd4   : > { %v1788_v27 = vpop.f32.mrf.mxu0 }
  0xd5   : > { %425 = vperm.xlu2 %1507, %v1788_v27  }
  0xdc   : > { %v1791_v28 = vpop.f32.mrf.mxu0 }
  0xdd   : > { %430 = vperm.xlu0 %1505, %v1791_v28  }
  0xe4   : > { %v1794_v29 = vpop.f32.mrf.mxu0 }
  0xe5   : > { %435 = vperm.xlu1 %1506, %v1794_v29  }
  0xec   : > { %v1797_v30 = vpop.f32.mrf.mxu0 }
  0xed   : > { %440 = vperm.xlu2 %1507, %v1797_v30  }
  0xf4   : > { %v1800_v31 = vpop.f32.mrf.mxu0 }
  0xf5   : > { %445 = vperm.xlu0 %1505, %v1800_v31  }
  0xfc   : > { %v1803_v32 = vpop.f32.mrf.mxu0 }
  0xfd   : > { %450 = vperm.xlu1 %1506, %v1803_v32  }
 0x104   : > { %v1806_v33 = vpop.f32.mrf.mxu0 }
 0x105   : > { %455 = vperm.xlu2 %1507, %v1806_v33  }
 0x107   : > { %v386_v36 = vpop.permute.xlu0 %385 }
 0x10c   : > { %v1809_v34 = vpop.f32.mrf.mxu0 }
 0x10d   : > { %1508 = vset.pattern.permute.xlu2 %v1639_v35  ;;  %460 = vperm.xlu0 %1505, %v1809_v34  }
 0x10e   : > { %1104 = vmatpush.msra.mxu2 %v1809_v34  ;;  %556 = vperm.xlu2 %1508, %v1809_v34  }
 0x10f   : > { %v391_v37 = vpop.permute.xlu0 %390  ;;  %v406_v40 = vpop.permute.xlu2 %405 }
 0x110   : > { %1105 = vmatpush.msra.mxu2 %v1806_v33 }
 0x112   : > { %1106 = vmatpush.msra.mxu2 %v1803_v32 }
 0x114   : > { %1107 = vmatpush.msra.mxu2 %v1800_v31 }
 0x115   : > { %1509 = vset.pattern.permute.xlu0 %v1639_v35 }
 0x116   : > { %1108 = vmatpush.msra.mxu2 %v1797_v30  ;;  %548 = vperm.xlu2 %1508, %v1803_v32  }
 0x117   : > { %552 = vperm.xlu0 %1509, %v1806_v33   ;;  %v396_v38 = vpop.permute.xlu1 %395  ;;  %v411_v41 = vpop.permute.xlu2 %410 }
 0x118   : > { %1109 = vmatpush.msra.mxu2 %v1794_v29 }
 0x11a   : > { %1110 = vmatpush.msra.mxu2 %v1791_v28 }
 0x11c   : > { %1111 = vmatpush.msra.mxu2 %v1788_v27 }
 0x11e   : > { %1112 = vmatpush.msra.mxu2 %v1785_v26  ;;  %544 = vperm.xlu2 %1508, %v1800_v31  }
 0x11f   : > { %540 = vperm.xlu0 %1509, %v1797_v30   ;;  %v401_v39 = vpop.permute.xlu1 %400 }
 0x120   : > { %1113 = vmatpush.msra.mxu2 %v1782_v25 }
 0x122   : > { %1114 = vmatpush.msra.mxu2 %v1779_v24 }
 0x124   : > { %1115 = vmatpush.msra.mxu2 %v1776_v23 }
 0x126   : > { %1116 = vmatpush.msra.mxu2 %v1773_v22  ;;  %536 = vperm.xlu2 %1508, %v1794_v29  }
 0x127   : > { %532 = vperm.xlu0 %1509, %v1791_v28  }
 0x128   : > { %1117 = vmatpush.msra.mxu2 %v1770_v21 }
 0x12a   : > { %1118 = vmatpush.msra.mxu2 %v1767_v20 }
 0x12c   : > { %1119 = vmatpush.msra.mxu2 %v1764_v19 }
 0x12e   : > { %528 = vperm.xlu2 %1508, %v1788_v27  }
 0x12f   : > { %524 = vperm.xlu0 %1509, %v1785_v26   ;;  %v426_v44 = vpop.permute.xlu2 %425 }
 0x132   : > { %463 = vxpose.xlu1.b32.start [1/16] %v386_v36, 128 }
 0x136   : > { %520 = vperm.xlu2 %1508, %v1782_v25  }
 0x137   : > { %516 = vperm.xlu0 %1509, %v1779_v24   ;;  %v416_v42 = vpop.permute.xlu0 %415 }
 0x13a   : > { %464 = vxpose.xlu1.b32.cont [2/16] %v391_v37, 128 }
 0x13e   : > { %512 = vperm.xlu2 %1508, %v1776_v23  }
 0x13f   : > { %508 = vperm.xlu0 %1509, %v1773_v22   ;;  %v421_v43 = vpop.permute.xlu1 %420 }
 0x142   : > { %465 = vxpose.xlu1.b32.cont [3/16] %v396_v38, 128 }
 0x146   : > { %504 = vperm.xlu2 %1508, %v1770_v21  }
 0x147   : > { %500 = vperm.xlu0 %1509, %v1767_v20   ;;  %v441_v47 = vpop.permute.xlu2 %440 }
 0x14a   : > { %466 = vxpose.xlu1.b32.cont [4/16] %v401_v39, 128 }
 0x14e   : > { %496 = vperm.xlu2 %1508, %v1764_v19  }
 0x14f   : > { %v431_v45 = vpop.permute.xlu0 %430 }
 0x152   : > { %467 = vxpose.xlu1.b32.cont [5/16] %v406_v40, 128 }
 0x157   : > { %v436_v46 = vpop.permute.xlu1 %435 }
 0x15a   : > { %468 = vxpose.xlu1.b32.cont [6/16] %v411_v41, 128 }
 0x15f   : > { %v456_v50 = vpop.permute.xlu2 %455 }
 0x162   : > { %469 = vxpose.xlu1.b32.cont [7/16] %v416_v42, 128 }
 0x167   : > { %v446_v48 = vpop.permute.xlu0 %445 }
 0x168   : > { %v557_v61 = vpop.permute.xlu2 %556 }
 0x16a   : > { %470 = vxpose.xlu1.b32.cont [8/16] %v421_v43, 128 }
 0x16f   : > { %v451_v49 = vpop.permute.xlu1 %450 }
 0x170   : > { %v549_v63 = vpop.permute.xlu2 %548 }
 0x172   : > { %471 = vxpose.xlu1.b32.cont [9/16] %v426_v44, 128 }
 0x178   : > { %v545_v2 = vpop.permute.xlu2 %544 }
 0x17a   : > { %472 = vxpose.xlu1.b32.cont [10/16] %v431_v45, 128 }
 0x17f   : > { %v461_v51 = vpop.permute.xlu0 %460 }
 0x180   : > { %v537_v5 = vpop.permute.xlu2 %536 }
 0x182   : > { %473 = vxpose.xlu1.b32.cont [11/16] %v436_v46, 128 }
 0x188   : > { %v529_v9 = vpop.permute.xlu2 %528 }
 0x189   : > { %v553_v1 = vpop.permute.xlu0 %552 }
 0x18a   : > { %474 = vxpose.xlu1.b32.cont [12/16] %v441_v47, 128 }
 0x190   : > { %v521_v12 = vpop.permute.xlu2 %520 }
 0x191   : > { %v541_v4 = vpop.permute.xlu0 %540 }
 0x192   : > { %475 = vxpose.xlu1.b32.cont [13/16] %v446_v48, 128 }
 0x198   : > { %v513_v40 = vpop.permute.xlu2 %512 }
 0x199   : > { %v533_v7 = vpop.permute.xlu0 %532 }
 0x19a   : > { %476 = vxpose.xlu1.b32.cont [14/16] %v451_v49, 128 }
 0x1a1   : > { %v525_v11 = vpop.permute.xlu0 %524 }
 0x1a2   : > { %477 = vxpose.xlu1.b32.cont [15/16] %v456_v50, 128 }
 0x1a9   : > { %v517_v36 = vpop.permute.xlu0 %516 }
 0x1aa   : > { %478 = vxpose.xlu1.b32.end [16/16] %v461_v51, 128 }
 0x1d6   : > { %v1844_v52 = vpop.trf.xlu1 }
 0x1de   : > { %v1846_v53 = vpop.trf.xlu1 }
 0x1e6   : > { %v1848_v54 = vpop.trf.xlu1 }
 0x1ee   : > { %v1850_v55 = vpop.trf.xlu1 }
 0x1f6   : > { %v1852_v56 = vpop.trf.xlu1 }
 0x1fe   : > { %v1854_v57 = vpop.trf.xlu1 }
 0x206   : > { %v485_v58 = vpop.trf.xlu1 }
 0x20e   : > { %v486_v59 = vpop.trf.xlu1 }
 0x20f   : > { %v566_v50 = vadd.f32 %v525_v11, %v486_v59  ;;  %v563_v59 = vadd.f32 %v513_v40, %v1852_v56 }
 0x211   : > { %vm582_vm9 = vcmp.gt.f32.partialorder %v566_v50, 0.0  ;;  %vm579_vm12 = vcmp.gt.f32.partialorder %v563_v59, 0.0 }
 0x216   : > { %v487_v60 = vpop.trf.xlu1 }
 0x217   : > { %v567_v47 = vadd.f32 %v529_v9, %v487_v60  ;;  %v564_v60 = vadd.f32 %v517_v36, %v1854_v57 }
 0x219   : > { %vm583_vm8 = vcmp.gt.f32.partialorder %v567_v47, 0.0  ;;  %vm580_vm11 = vcmp.gt.f32.partialorder %v564_v60, 0.0 }
 0x21e   : > { %v488_v62 = vpop.trf.xlu1 }
 0x21f   : > { %v568_v44 = vadd.f32 %v533_v7, %v488_v62 }
 0x221   : > { %vm584_vm7 = vcmp.gt.f32.partialorder %v568_v44, 0.0 }
 0x226   : > { %v489_v0 = vpop.trf.xlu1 }
 0x227   : > { %v569_v41 = vadd.f32 %v537_v5, %v489_v0  ;;  %v565_v0 = vadd.f32 %v521_v12, %v485_v58 }
 0x229   : > { %v601_v49 = vmul.f32 0.2, %v569_v41  ;;  %vm585_vm6 = vcmp.gt.f32.partialorder %v569_v41, 0.0  ;;  %vm581_vm10 = vcmp.gt.f32.partialorder %v565_v0, 0.0 }
 0x22b   : > { %v617_v62 = vsel %vm585_vm6, %v569_v41, %v601_v49  ;;  %v1423_v41 = vld [vmem:[%s1866_s13 + $0x8] sm:$0xff]  }
 0x22e   : > { %v490_v3 = vpop.trf.xlu1 }
 0x22f   : > { %v570_v37 = vadd.f32 %v541_v4, %v490_v3  ;;  %v598_v4 = vmul.f32 0.2, %v566_v50 }
 0x231   : > { %v602_v46 = vmul.f32 0.2, %v570_v37  ;;  %vm586_vm5 = vcmp.gt.f32.partialorder %v570_v37, 0.0  ;;  %v614_v7 = vsel %vm582_vm9, %v566_v50, %v598_v4 }
 0x233   : > { %v618_v51 = vsel %vm586_vm5, %v570_v37, %v602_v46 }
 0x236   : > { %v491_v6 = vpop.trf.xlu1 }
 0x237   : > { %v571_v17 = vadd.f32 %v545_v2, %v491_v6  ;;  %v505_v2 = vpop.permute.xlu2 %504  ;;  %v597_v6 = vmul.f32 0.2, %v565_v0 }
 0x238   : > { %v561_v57 = vadd.f32 %v505_v2, %v1848_v54 }
 0x239   : > { %v603_v43 = vmul.f32 0.2, %v571_v17  ;;  %vm587_vm4 = vcmp.gt.f32.partialorder %v571_v17, 0.0  ;;  %v613_v9 = vsel %vm581_vm10, %v565_v0, %v597_v6 }
 0x23a   : > { %vm577_vm14 = vcmp.gt.f32.partialorder %v561_v57, 0.0 }
 0x23b   : > { %v619_v48 = vsel %vm587_vm4, %v571_v17, %v603_v43  ;;  %v1869_v17 = vld [vmem:[%s1866_s13] sm:$0xff]  }
 0x23c   : > { %v1393_v37 = vunpack.c.l.bf16 %v1869_v17  ;;  %v1394_v40 = vunpack.c.h.bf16 %v1869_v17 }
 0x23e   : > { %v492_v8 = vpop.trf.xlu1 }
 0x23f   : > { %v572_v15 = vadd.f32 %v549_v63, %v492_v8  ;;  %v509_v63 = vpop.permute.xlu0 %508  ;;  %v596_v8 = vmul.f32 0.2, %v564_v60 }
 0x240   : > { %v562_v58 = vadd.f32 %v509_v63, %v1850_v55 }
 0x241   : > { %v604_v39 = vmul.f32 0.2, %v572_v15  ;;  %vm588_vm3 = vcmp.gt.f32.partialorder %v572_v15, 0.0  ;;  %v612_v12 = vsel %vm580_vm11, %v564_v60, %v596_v8 }
 0x242   : > { %vm578_vm13 = vcmp.gt.f32.partialorder %v562_v58, 0.0 }
 0x243   : > { %v620_v45 = vsel %vm588_vm3, %v572_v15, %v604_v39 }
 0x246   : > { %v493_v10 = vpop.trf.xlu1 }
 0x247   : > { %v573_v13 = vadd.f32 %v553_v1, %v493_v10  ;;  %v599_v1 = vmul.f32 0.2, %v567_v47  ;;  %v595_v10 = vmul.f32 0.2, %v563_v59  ;;  %v501_v11 = vpop.permute.xlu0 %500 }
 0x248   : > { %v560_v56 = vadd.f32 %v501_v11, %v1846_v53 }
 0x249   : > { %v605_v35 = vmul.f32 0.2, %v573_v13  ;;  %vm589_vm2 = vcmp.gt.f32.partialorder %v573_v13, 0.0  ;;  %v615_v5 = vsel %vm583_vm8, %v567_v47, %v599_v1  ;;  %v611_v15 = vsel %vm579_vm12, %v563_v59, %v595_v10 }
 0x24a   : > { %v592_v54 = vmul.f32 0.2, %v560_v56  ;;  %vm576_vm15 = vcmp.gt.f32.partialorder %v560_v56, 0.0 }
 0x24b   : > { %v621_v42 = vsel %vm589_vm2, %v573_v13, %v605_v35  ;;  %v594_v13 = vmul.f32 0.2, %v562_v58  ;;  %v1872_v35 = vld [vmem:[%s1866_s13 + $0x30] sm:$0xff]   ;;  %vm705_vm2 = vcmp.lt.f32.partialorder %v1394_v40, 0.5 }
 0x24c   : > { %v608_v36 = vsel %vm576_vm15, %v560_v56, %v592_v54 }
 0x24d   : > { %v610_v53 = vsel %vm578_vm13, %v562_v58, %v594_v13 }
 0x24e   : > { %v494_v14 = vpop.trf.xlu1 }
 0x24f   : > { %v574_v16 = vadd.f32 %v557_v61, %v494_v14  ;;  %v600_v61 = vmul.f32 0.2, %v568_v44  ;;  %v497_v14 = vpop.permute.xlu2 %496 }
 0x250   : > { %v559_v55 = vadd.f32 %v497_v14, %v1844_v52 }
 0x251   : > { %vm590_vm1 = vcmp.gt.f32.partialorder %v574_v16, 0.0  ;;  %v606_v18 = vmul.f32 0.2, %v574_v16  ;;  %v616_v3 = vsel %vm584_vm7, %v568_v44, %v600_v61 }
 0x252   : > { %vm575_vm0 = vcmp.gt.f32.partialorder %v559_v55, 0.0 }
 0x253   : > { %v622_v38 = vsel %vm590_vm1, %v574_v16, %v606_v18  ;;  %v593_v16 = vmul.f32 0.2, %v561_v57  ;;  %v591_v18 = vmul.f32 0.2, %v559_v55  ;;  %vm704_vm1 = vcmp.lt.f32.partialorder %v1393_v37, 0.5 }
 0x254   : > { %639 = vmatpush.msra.mxu1 %v622_v38  ;;  %1430 = vmatpush.msra.mxu3 %v622_v38  ;;  %v1417_v38 = vunpack.c.l.bf16 %v1872_v35 }
 0x255   : > { %v609_v52 = vsel %vm577_vm14, %v561_v57, %v593_v16  ;;  %v607_v39 = vsel %vm575_vm0, %v559_v55, %v591_v18 }
 0x256   : > { %640 = vmatpush.msra.mxu1 %v621_v42  ;;  %1431 = vmatpush.msra.mxu3 %v621_v42  ;;  %vm716_vm5 = vcmp.lt.f32.partialorder %v1417_v38, 0.5 }
 0x258   : > { %641 = vmatpush.msra.mxu1 %v620_v45  ;;  %1432 = vmatpush.msra.mxu3 %v620_v45 }
 0x25a   : > { %642 = vmatpush.msra.mxu1 %v619_v48  ;;  %1433 = vmatpush.msra.mxu3 %v619_v48 }
 0x25c   : > { %643 = vmatpush.msra.mxu1 %v618_v51  ;;  %1434 = vmatpush.msra.mxu3 %v618_v51 }
 0x25e   : > { %644 = vmatpush.msra.mxu1 %v617_v62  ;;  %1435 = vmatpush.msra.mxu3 %v617_v62 }
 0x260   : > { %645 = vmatpush.msra.mxu1 %v616_v3  ;;  %1436 = vmatpush.msra.mxu3 %v616_v3 }
 0x262   : > { %646 = vmatpush.msra.mxu1 %v615_v5  ;;  %1437 = vmatpush.msra.mxu3 %v615_v5 }
 0x264   : > { %647 = vmatpush.msra.mxu1 %v614_v7  ;;  %1438 = vmatpush.msra.mxu3 %v614_v7 }
 0x266   : > { %648 = vmatpush.msra.mxu1 %v613_v9  ;;  %1439 = vmatpush.msra.mxu3 %v613_v9 }
 0x268   : > { %649 = vmatpush.msra.mxu1 %v612_v12  ;;  %1440 = vmatpush.msra.mxu3 %v612_v12 }
 0x26a   : > { %650 = vmatpush.msra.mxu1 %v611_v15  ;;  %1441 = vmatpush.msra.mxu3 %v611_v15 }
 0x26c   : > { %651 = vmatpush.msra.mxu1 %v610_v53  ;;  %1442 = vmatpush.msra.mxu3 %v610_v53 }
 0x26e   : > { %652 = vmatpush.msra.mxu1 %v609_v52  ;;  %1443 = vmatpush.msra.mxu3 %v609_v52 }
 0x270   : > { %653 = vmatpush.msra.mxu1 %v608_v36  ;;  %1444 = vmatpush.msra.mxu3 %v608_v36 }
 0x272   : > { %654 = vmatpush.msra.mxu1 %v607_v39  ;;  %1445 = vmatpush.msra.mxu3 %v607_v39 }
 0x273   : > { %655 = vmatmul.f32.vlgmr.msra.gmra.mxu1 %v1393_v37  ;;  %691 = vmatmul.f32.vlgmr.msra.gmra.mxu3 %v1417_v38 }
 0x274   : > { %1446 = vmatpush.msrb.mxu3 %v1809_v34  ;;  %v1397_v34 = vunpack.c.l.bf16 %v1423_v41 }
 0x276   : > { %1447 = vmatpush.msrb.mxu3 %v1806_v33  ;;  %vm706_vm3 = vcmp.lt.f32.partialorder %v1397_v34, 0.5 }
 0x278   : > { %1448 = vmatpush.msrb.mxu3 %v1803_v32  ;;  %v1913_v32 = vld [vmem:[%s1866_s13 + $0x38] sm:$0xff]  }
 0x279   : > { %v1421_v33 = vunpack.c.l.bf16 %v1913_v32  ;;  %v1422_v45 = vunpack.c.h.bf16 %v1913_v32 }
 0x27a   : > { %1449 = vmatpush.msrb.mxu3 %v1800_v31  ;;  %v1398_v31 = vunpack.c.h.bf16 %v1423_v41 }
 0x27b   : > { %658 = vmatmul.f32.gmra.mxu1 %v1394_v40  ;;  %vm718_vm14 = vcmp.lt.f32.partialorder %v1421_v33, 0.5  ;;  %vm719_vm0 = vcmp.lt.f32.partialorder %v1422_v45, 0.5 }
 0x27c   : > { %1450 = vmatpush.msrb.mxu3 %v1797_v30  ;;  %vm707_vm4 = vcmp.lt.f32.partialorder %v1398_v31, 0.5 }
 0x27e   : > { %1451 = vmatpush.msrb.mxu3 %v1794_v29  ;;  %v1424_v29 = vld [vmem:[%s1866_s13 + $0x10] sm:$0xff]  }
 0x280   : > { %1452 = vmatpush.msrb.mxu3 %v1791_v28  ;;  %v1909_v28 = vld [vmem:[%s1866_s13 + $0x28] sm:$0xff]  }
 0x281   : > { %v1413_v30 = vunpack.c.l.bf16 %v1909_v28  ;;  %v1414_v43 = vunpack.c.h.bf16 %v1909_v28 }
 0x282   : > { %1453 = vmatpush.msrb.mxu3 %v1788_v27  ;;  %v1401_v27 = vunpack.c.l.bf16 %v1424_v29 }
 0x283   : > { %661 = vmatmul.f32.gmra.mxu1 %v1397_v34  ;;  %vm714_vm13 = vcmp.lt.f32.partialorder %v1413_v30, 0.5  ;;  %vm715_vm15 = vcmp.lt.f32.partialorder %v1414_v43, 0.5 }
 0x284   : > { %1454 = vmatpush.msrb.mxu3 %v1785_v26  ;;  %vm708_vm6 = vcmp.lt.f32.partialorder %v1401_v27, 0.5 }
 0x286   : > { %1455 = vmatpush.msrb.mxu3 %v1782_v25  ;;  %v1418_v25 = vunpack.c.h.bf16 %v1872_v35 }
 0x288   : > { %1456 = vmatpush.msrb.mxu3 %v1779_v24  ;;  %vm717_vm11 = vcmp.lt.f32.partialorder %v1418_v25, 0.5 }
 0x289   : > { %694 = vmatmul.f32.gmra.mxu3 %v1418_v25 }
 0x28a   : > { %1457 = vmatpush.msrb.mxu3 %v1776_v23  ;;  %v1402_v23 = vunpack.c.h.bf16 %v1424_v29 }
 0x28b   : > { %664 = vmatmul.f32.gmra.mxu1 %v1398_v31 }
 0x28c   : > { %1458 = vmatpush.msrb.mxu3 %v1773_v22  ;;  %v1425_v22 = vld [vmem:[%s1866_s13 + $0x18] sm:$0xff]   ;;  %vm709_vm7 = vcmp.lt.f32.partialorder %v1402_v23, 0.5 }
 0x28d   : > { %v1405_v24 = vunpack.c.l.bf16 %v1425_v22  ;;  %v1406_v26 = vunpack.c.h.bf16 %v1425_v22 }
 0x28e   : > { %1459 = vmatpush.msrb.mxu3 %v1770_v21  ;;  %v1902_v21 = vld [vmem:[%s1866_s13 + $0x20] sm:$0xff]   ;;  %s1594_s13 = scalar_lea.hbm %s2166_s4, 256 }
 0x28f   : > { %vm710_vm8 = vcmp.lt.f32.partialorder %v1405_v24, 0.5  ;;  %vm711_vm9 = vcmp.lt.f32.partialorder %v1406_v26, 0.5  ;;  %p1596_p1 = scmp.lt.s32.totalorder %s1594_s13, %s1590_s11 }
 0x290   : > { %1460 = vmatpush.msrb.mxu3 %v1767_v20  ;;  %v1409_v20 = vunpack.c.l.bf16 %v1902_v21 }
 0x291   : > { %697 = vmatmul.f32.gmra.mxu3 %v1421_v33  ;;  %p1597_p2 = por %p1596_p1, %p1595_p0 }
 0x292   : > { %1461 = vmatpush.msrb.mxu3 %v1764_v19  ;;  %v1410_v19 = vunpack.c.h.bf16 %v1902_v21  ;;  %vm712_vm10 = vcmp.lt.f32.partialorder %v1409_v20, 0.5 }
 0x293   : > { %667 = vmatmul.f32.gmra.mxu1 %v1401_v27  ;;  %p1598_p3 = pnand %p1597_p2, %p1593_p13 }
 0x294   : > { %vm713_vm12 = vcmp.lt.f32.partialorder %v1410_v19, 0.5 }
 0x299   : > { %700 = vmatmul.f32.gmra.mxu3 %v1422_v45 }
 0x29b   : > { %670 = vmatmul.f32.gmra.mxu1 %v1402_v23 }
 0x2a3   : > { %673 = vmatmul.f32.gmra.mxu1 %v1405_v24 }
 0x2ab   : > { %676 = vmatmul.f32.gmra.mxu1 %v1406_v26 }
 0x2b3   : > { %679 = vmatmul.f32.gmra.mxu1 %v1409_v20 }
 0x2bb   : > { %682 = vmatmul.f32.gmra.mxu1 %v1410_v19 }
 0x2c3   : > { %685 = vmatmul.f32.gmra.mxu1 %v1413_v30 }
 0x2cb   : > { %688 = vmatmul.f32.gmra.mxu1 %v1414_v43 }
 0x2f0   : > { %v656_v42 = vpop.f32.mrf.mxu1 }
 0x2f1   : > { %v720_v44 = vsel %vm704_vm1, -1e+30, %v656_v42 }
 0x2f2   : > { %736 = vmax.xlane.f32.xlu0 %v720_v44 }
 0x2f6   : > { %v692_v61 = vpop.f32.mrf.mxu3 }
 0x2f7   : > { %v1928_v63 = vsel %vm716_vm5, -1e+30, %v692_v61 }
 0x2f8   : > { %v659_v46 = vpop.f32.mrf.mxu1 }
 0x2f9   : > { %v721_v47 = vsel %vm705_vm2, -1e+30, %v659_v46 }
 0x2fa   : > { %738 = vmax.xlane.f32.xlu2 %v721_v47 }
 0x300   : > { %v662_v48 = vpop.f32.mrf.mxu1 }
 0x301   : > { %v722_v49 = vsel %vm706_vm3, -1e+30, %v662_v48 }
 0x302   : > { %740 = vmax.xlane.f32.xlu2 %v722_v49 }
 0x308   : > { %v665_v50 = vpop.f32.mrf.mxu1 }
 0x309   : > { %v723_v51 = vsel %vm707_vm4, -1e+30, %v665_v50 }
 0x30a   : > { %742 = vmax.xlane.f32.xlu0 %v723_v51 }
 0x30c   : > { %v695_v58 = vpop.f32.mrf.mxu3 }
 0x30d   : > { %v1945_v7 = vsel %vm717_vm11, -1e+30, %v695_v58 }
 0x310   : > { %v668_v0 = vpop.f32.mrf.mxu1 }
 0x311   : > { %v724_v62 = vsel %vm708_vm6, -1e+30, %v668_v0 }
 0x312   : > { %760 = vmax.xlane.f32.xlu0 %v1928_v63  ;;  %744 = vmax.xlane.f32.xlu2 %v724_v62 }
 0x314   : > { %v698_v34 = vpop.f32.mrf.mxu3 }
 0x315   : > { %v1975_v25 = vsel %vm718_vm14, -1e+30, %v698_v34 }
 0x318   : > { %v671_v1 = vpop.f32.mrf.mxu1 }
 0x319   : > { %v1931_v2 = vsel %vm709_vm7, -1e+30, %v671_v1 }
 0x31a   : > { %746 = vmax.xlane.f32.xlu0 %v1931_v2 }
 0x31c   : > { %v701_v26 = vpop.f32.mrf.mxu3 }
 0x31d   : > { %v1987_v19 = vsel %vm719_vm0, -1e+30, %v701_v26 }
 0x320   : > { %v674_v60 = vpop.f32.mrf.mxu1 }
 0x321   : > { %v1934_v3 = vsel %vm710_vm8, -1e+30, %v674_v60 }
 0x322   : > { %748 = vmax.xlane.f32.xlu2 %v1934_v3 }
 0x328   : > { %v677_v4 = vpop.f32.mrf.mxu1 }
 0x329   : > { %v1937_v59 = vsel %vm711_vm9, -1e+30, %v677_v4 }
 0x32a   : > { %750 = vmax.xlane.f32.xlu2 %v1937_v59 }
 0x330   : > { %v680_v5 = vpop.f32.mrf.mxu1 }
 0x331   : > { %v1940_v6 = vsel %vm712_vm10, -1e+30, %v680_v5 }
 0x332   : > { %752 = vmax.xlane.f32.xlu2 %v1940_v6 }
 0x338   : > { %v683_v55 = vpop.f32.mrf.mxu1 }
 0x339   : > { %v1956_v17 = vsel %vm713_vm12, -1e+30, %v683_v55 }
 0x33a   : > { %762 = vmax.xlane.f32.xlu2 %v1945_v7 }
 0x340   : > { %v686_v35 = vpop.f32.mrf.mxu1 }
 0x341   : > { %v1964_v39 = vsel %vm714_vm13, -1e+30, %v686_v35 }
 0x348   : > { %v689_v31 = vpop.f32.mrf.mxu1 }
 0x349   : > { %v1977_v23 = vsel %vm715_vm15, -1e+30, %v689_v31 }
 0x365   : > { %v737_v8 = vpop.xlane.xlu0 %736 }
 0x366   : > { %v768_v57 = vsub.f32 %v720_v44, %v737_v8 }
 0x368   : > { %v784_v9 = vmul.f32 1.442695, %v768_v57 }
 0x36a   : > { %1510 = vpow2.f32 %v784_v9 }
 0x36d   : > { %v739_v10 = vpop.xlane.xlu2 %738 }
 0x36e   : > { %v769_v11 = vsub.f32 %v721_v47, %v739_v10 }
 0x370   : > { %v1948_v56 = vpop.eup %1510  ;;  %v786_v12 = vmul.f32 1.442695, %v769_v11 }
 0x371   : > { %816 = vadd.xlane.f32.xlu0 %v1948_v56 }
 0x372   : > { %1512 = vpow2.f32 %v786_v12 }
 0x375   : > { %v741_v13 = vpop.xlane.xlu2 %740 }
 0x376   : > { %v770_v14 = vsub.f32 %v722_v49, %v741_v13 }
 0x378   : > { %v1951_v15 = vpop.eup %1512  ;;  %v788_v16 = vmul.f32 1.442695, %v770_v14 }
 0x379   : > { %818 = vadd.xlane.f32.xlu0 %v1951_v15 }
 0x37a   : > { %1514 = vpow2.f32 %v788_v16 }
 0x37d   : > { %v743_v53 = vpop.xlane.xlu0 %742 }
 0x37e   : > { %v771_v54 = vsub.f32 %v723_v51, %v743_v53 }
 0x380   : > { %v1958_v52 = vpop.eup %1514  ;;  %v790_v18 = vmul.f32 1.442695, %v771_v54 }
 0x381   : > { %820 = vadd.xlane.f32.xlu2 %v1958_v52  ;;  %754 = vmax.xlane.f32.xlu0 %v1956_v17 }
 0x382   : > { %1516 = vpow2.f32 %v790_v18 }
 0x385   : > { %v761_v36 = vpop.xlane.xlu0 %760  ;;  %v745_v37 = vpop.xlane.xlu2 %744 }
 0x386   : > { %v772_v38 = vsub.f32 %v724_v62, %v745_v37  ;;  %v780_v44 = vsub.f32 %v1928_v63, %v761_v36 }
 0x388   : > { %v1966_v40 = vpop.eup %1516  ;;  %v792_v41 = vmul.f32 1.442695, %v772_v38  ;;  %v808_v45 = vmul.f32 1.442695, %v780_v44 }
 0x389   : > { %822 = vadd.xlane.f32.xlu0 %v1966_v40  ;;  %756 = vmax.xlane.f32.xlu2 %v1964_v39 }
 0x38a   : > { %1518 = vpow2.f32 %v792_v41 }
 0x38d   : > { %v747_v29 = vpop.xlane.xlu0 %746 }
 0x38e   : > { %v773_v27 = vsub.f32 %v1931_v2, %v747_v29 }
 0x390   : > { %v794_v22 = vmul.f32 1.442695, %v773_v27  ;;  %v1979_v24 = vpop.eup %1518 }
 0x391   : > { %764 = vmax.xlane.f32.xlu0 %v1975_v25  ;;  %758 = vmax.xlane.f32.xlu2 %v1977_v23 }
 0x392   : > { %1520 = vpow2.f32 %v794_v22  ;;  %824 = vadd.xlane.f32.xlu1 %v1979_v24 }
 0x395   : > { %v749_v21 = vpop.xlane.xlu2 %748 }
 0x396   : > { %v774_v20 = vsub.f32 %v1934_v3, %v749_v21 }
 0x398   : > { %v1989_v28 = vpop.eup %1520  ;;  %v796_v30 = vmul.f32 1.442695, %v774_v20 }
 0x399   : > { %766 = vmax.xlane.f32.xlu0 %v1987_v19  ;;  %826 = vadd.xlane.f32.xlu2 %v1989_v28 }
 0x39a   : > { %1522 = vpow2.f32 %v796_v30 }
 0x39d   : > { %v751_v33 = vpop.xlane.xlu2 %750 }
 0x39e   : > { %v775_v42 = vsub.f32 %v1937_v59, %v751_v33 }
 0x3a0   : > { %v1994_v43 = vpop.eup %1522  ;;  %v798_v32 = vmul.f32 1.442695, %v775_v42 }
 0x3a1   : > { %828 = vadd.xlane.f32.xlu0 %v1994_v43 }
 0x3a2   : > { %1524 = vpow2.f32 %v798_v32 }
 0x3a3   : > { %1526 = vpow2.f32 %v808_v45 }
 0x3a5   : > { %v753_v46 = vpop.xlane.xlu2 %752 }
 0x3a6   : > { %v776_v47 = vsub.f32 %v1940_v6, %v753_v46 }
 0x3a8   : > { %v1999_v48 = vpop.eup %1524  ;;  %v800_v49 = vmul.f32 1.442695, %v776_v47 }
 0x3a9   : > { %830 = vadd.xlane.f32.xlu2 %v1999_v48  ;;  %v2003_v61 = vpop.eup %1526 }
 0x3aa   : > { %1528 = vpow2.f32 %v800_v49 }
 0x3ad   : > { %v763_v50 = vpop.xlane.xlu2 %762 }
 0x3ae   : > { %v781_v51 = vsub.f32 %v1945_v7, %v763_v50 }
 0x3b0   : > { %v2005_v63 = vpop.eup %1528  ;;  %v810_v0 = vmul.f32 1.442695, %v781_v51 }
 0x3b1   : > { %832 = vadd.xlane.f32.xlu0 %v2005_v63  ;;  %840 = vadd.xlane.f32.xlu2 %v2003_v61 }
 0x3b2   : > { %1530 = vpow2.f32 %v810_v0 }
 0x3b8   : > { %v2009_v62 = vpop.eup %1530 }
 0x3b9   : > { %842 = vadd.xlane.f32.xlu2 %v2009_v62 }
 0x3e4   : > { %v817_v1 = vpop.xlane.xlu0 %816 }
 0x3e5   : > { %1532 = vrcp.f32 %v817_v1  ;;  %v859_v59 = vand.u32 2147483648, %v817_v1  ;;  %v857_v6 = vand.u32 2147483647, %v817_v1  ;;  %vm853_vm2 = vweird.f32 %v817_v1 }
 0x3e7   : > { %v860_v8 = vor.u32 1.1754944e-38, %v859_v59  ;;  %vm858_vm4 = vcmp.eq.f32.partialorder %v857_v6, 8.507059e+37 }
 0x3eb   : > { %v1533_v2 = vpop.eup %1532 }
 0x3ec   : > { %v849_v60 = vmul.f32 %v1533_v2, %v817_v1  ;;  %v819_v3 = vpop.xlane.xlu0 %818  ;;  %vm854_vm1 = vweird.f32 %v1533_v2 }
 0x3ed   : > { %1534 = vrcp.f32 %v819_v3  ;;  %vm855_vm3 = vmor %vm853_vm2, %vm854_vm1  ;;  %v873_v53 = vand.u32 2147483648, %v819_v3  ;;  %v871_v18 = vand.u32 2147483647, %v819_v3  ;;  %vm867_vm6 = vweird.f32 %v819_v3 }
 0x3ee   : > { %v850_v4 = vsub.f32 1.0, %v849_v60 }
 0x3ef   : > { %vm872_vm8 = vcmp.eq.f32.partialorder %v871_v18, 8.507059e+37 }
 0x3f0   : > { %v851_v5 = vmul.f32 %v1533_v2, %v850_v4 }
 0x3f2   : > { %v852_v58 = vadd.f32 %v1533_v2, %v851_v5 }
 0x3f3   : > { %v1535_v7 = vpop.eup %1534 }
 0x3f4   : > { %v863_v57 = vmul.f32 %v1535_v7, %v819_v3  ;;  %v821_v9 = vpop.xlane.xlu2 %820  ;;  %v755_v10 = vpop.xlane.xlu0 %754  ;;  %v856_v11 = vsel %vm855_vm3, %v1533_v2, %v852_v58  ;;  %vm868_vm5 = vweird.f32 %v1535_v7 }
 0x3f5   : > { %1536 = vrcp.f32 %v821_v9  ;;  %v777_v12 = vsub.f32 %v1956_v17, %v755_v10  ;;  %v861_v13 = vsel %vm858_vm4, %v860_v8, %v856_v11  ;;  %vm869_vm7 = vmor %vm867_vm6, %vm868_vm5  ;;  %v874_v17 = vor.u32 1.1754944e-38, %v873_v53 }
 0x3f6   : > { %v864_v14 = vsub.f32 1.0, %v863_v57  ;;  %v1072_v55 = vmul.f32 %v1948_v56, %v861_v13  ;;  %v887_v21 = vand.u32 2147483648, %v821_v9  ;;  %v885_v30 = vand.u32 2147483647, %v821_v9 }
 0x3f7   : > { %v802_v16 = vmul.f32 1.442695, %v777_v12  ;;  %vm881_vm10 = vweird.f32 %v821_v9 }
 0x3f8   : > { %v865_v54 = vmul.f32 %v1535_v7, %v864_v14  ;;  %1088 = vst [vmem:[%s2017_s22] sm:$0xff] %v1072_v55  ;;  %1120 = vmatmul.f32.vlgmr.msra.gmra.mxu2 %v1072_v55  ;;  %vm886_vm12 = vcmp.eq.f32.partialorder %v885_v30, 8.507059e+37 }
 0x3f9   : > { %1538 = vpow2.f32 %v802_v16 }
 0x3fa   : > { %v866_v35 = vadd.f32 %v1535_v7, %v865_v54 }
 0x3fb   : > { %v1537_v36 = vpop.eup %1536 }
 0x3fc   : > { %v877_v37 = vmul.f32 %v1537_v36, %v821_v9  ;;  %v823_v38 = vpop.xlane.xlu0 %822  ;;  %v757_v56 = vpop.xlane.xlu2 %756  ;;  %v870_v41 = vsel %vm869_vm7, %v1535_v7, %v866_v35  ;;  %vm882_vm9 = vweird.f32 %v1537_v36 }
 0x3fd   : > { %1540 = vrcp.f32 %v823_v38  ;;  %v778_v34 = vsub.f32 %v1964_v39, %v757_v56  ;;  %v875_v31 = vsel %vm872_vm8, %v874_v17, %v870_v41  ;;  %vm883_vm11 = vmor %vm881_vm10, %vm882_vm9  ;;  %v888_v39 = vor.u32 1.1754944e-38, %v887_v21 }
 0x3fe   : > { %v878_v29 = vsub.f32 1.0, %v877_v37  ;;  %v1073_v27 = vmul.f32 %v1951_v15, %v875_v31  ;;  %v901_v4 = vand.u32 2147483648, %v823_v38  ;;  %vm895_vm14 = vweird.f32 %v823_v38 }
 0x3ff   : > { %v2022_v22 = vpop.eup %1538  ;;  %v804_v26 = vmul.f32 1.442695, %v778_v34 }
 0x400   : > { %v879_v20 = vmul.f32 %v1537_v36, %v878_v29  ;;  %834 = vadd.xlane.f32.xlu0 %v2022_v22  ;;  %1089 = vst [vmem:[%s2017_s22 + $0x8] sm:$0xff] %v1073_v27  ;;  %1123 = vmatmul.f32.gmra.mxu2 %v1073_v27  ;;  %v902_v7 = vor.u32 1.1754944e-38, %v901_v4 }
 0x401   : > { %1542 = vpow2.f32 %v804_v26 }
 0x402   : > { %v880_v33 = vadd.f32 %v1537_v36, %v879_v20 }
 0x403   : > { %v1541_v42 = vpop.eup %1540 }
 0x404   : > { %v891_v32 = vmul.f32 %v1541_v42, %v823_v38  ;;  %v765_v44 = vpop.xlane.xlu0 %764  ;;  %v759_v15 = vpop.xlane.xlu2 %758  ;;  %v884_v45 = vsel %vm883_vm11, %v1537_v36, %v880_v33  ;;  %vm896_vm13 = vweird.f32 %v1541_v42 }
 0x405   : > { %v825_v46 = vpop.xlane.xlu1 %824  ;;  %v782_v47 = vsub.f32 %v1975_v25, %v765_v44  ;;  %v779_v49 = vsub.f32 %v1977_v23, %v759_v15  ;;  %v889_v50 = vsel %vm886_vm12, %v888_v39, %v884_v45  ;;  %v899_v25 = vand.u32 2147483647, %v823_v38  ;;  %vm897_vm15 = vmor %vm895_vm14, %vm896_vm13 }
 0x406   : > { %v892_v51 = vsub.f32 1.0, %v891_v32  ;;  %1544 = vrcp.f32 %v825_v46  ;;  %v1074_v60 = vmul.f32 %v1958_v52, %v889_v50  ;;  %v915_v14 = vand.u32 2147483648, %v825_v46 }
 0x407   : > { %v2028_v0 = vpop.eup %1542  ;;  %v812_v1 = vmul.f32 1.442695, %v782_v47  ;;  %v806_v2 = vmul.f32 1.442695, %v779_v49  ;;  %vm900_vm0 = vcmp.eq.f32.partialorder %v899_v25, 8.507059e+37  ;;  %vm909_vm2 = vweird.f32 %v825_v46 }
 0x408   : > { %v893_v3 = vmul.f32 %v1541_v42, %v892_v51  ;;  %836 = vadd.xlane.f32.xlu0 %v2028_v0  ;;  %1090 = vst [vmem:[%s2017_s22 + $0x10] sm:$0xff] %v1074_v60  ;;  %1126 = vmatmul.f32.gmra.mxu2 %v1074_v60  ;;  %v916_v54 = vor.u32 1.1754944e-38, %v915_v14 }
 0x409   : > { %1546 = vpow2.f32 %v812_v1 }
 0x40a   : > { %1548 = vpow2.f32 %v806_v2  ;;  %v894_v23 = vadd.f32 %v1541_v42, %v893_v3 }
 0x40c   : > { %v1545_v59 = vpop.eup %1544  ;;  %v767_v5 = vpop.xlane.xlu0 %766  ;;  %v898_v58 = vsel %vm897_vm15, %v1541_v42, %v894_v23 }
 0x40d   : > { %v827_v6 = vpop.xlane.xlu2 %826  ;;  %v905_v8 = vmul.f32 %v1545_v59, %v825_v46  ;;  %v783_v52 = vsub.f32 %v1987_v19, %v767_v5  ;;  %v903_v57 = vsel %vm900_vm0, %v902_v7, %v898_v58  ;;  %vm910_vm1 = vweird.f32 %v1545_v59 }
 0x40e   : > { %1550 = vrcp.f32 %v827_v6  ;;  %v1075_v12 = vmul.f32 %v1966_v40, %v903_v57  ;;  %v913_v19 = vand.u32 2147483647, %v825_v46  ;;  %vm911_vm3 = vmor %vm909_vm2, %vm910_vm1  ;;  %v929_v56 = vand.u32 2147483648, %v827_v6 }
 0x40f   : > { %v2034_v9 = vpop.eup %1546  ;;  %v906_v10 = vsub.f32 1.0, %v905_v8  ;;  %v814_v11 = vmul.f32 1.442695, %v783_v52  ;;  %v927_v34 = vand.u32 2147483647, %v827_v6  ;;  %vm923_vm6 = vweird.f32 %v827_v6 }
 0x410   : > { %v2037_v13 = vpop.eup %1548  ;;  %844 = vadd.xlane.f32.xlu2 %v2034_v9  ;;  %1091 = vst [vmem:[%s2017_s22 + $0x18] sm:$0xff] %v1075_v12  ;;  %1129 = vmatmul.f32.gmra.mxu2 %v1075_v12  ;;  %vm914_vm4 = vcmp.eq.f32.partialorder %v913_v19, 8.507059e+37  ;;  %v930_v27 = vor.u32 1.1754944e-38, %v929_v56 }
 0x411   : > { %v907_v55 = vmul.f32 %v1545_v59, %v906_v10  ;;  %1552 = vpow2.f32 %v814_v11  ;;  %838 = vadd.xlane.f32.xlu0 %v2037_v13  ;;  %vm928_vm8 = vcmp.eq.f32.partialorder %v927_v34, 8.507059e+37 }
 0x413   : > { %v908_v53 = vadd.f32 %v1545_v59, %v907_v55 }
 0x414   : > { %v1551_v16 = vpop.eup %1550  ;;  %v829_v18 = vpop.xlane.xlu0 %828 }
 0x415   : > { %v919_v40 = vmul.f32 %v1551_v16, %v827_v6  ;;  %1554 = vrcp.f32 %v829_v18  ;;  %v912_v35 = vsel %vm911_vm3, %v1545_v59, %v908_v53  ;;  %vm924_vm5 = vweird.f32 %v1551_v16 }
 0x416   : > { %v917_v17 = vsel %vm914_vm4, %v916_v54, %v912_v35  ;;  %vm925_vm7 = vmor %vm923_vm6, %vm924_vm5  ;;  %v943_v42 = vand.u32 2147483648, %v829_v18  ;;  %v941_v32 = vand.u32 2147483647, %v829_v18  ;;  %vm937_vm10 = vweird.f32 %v829_v18 }
 0x417   : > { %v920_v36 = vsub.f32 1.0, %v919_v40  ;;  %v2042_v37 = vpop.eup %1552  ;;  %v1076_v38 = vmul.f32 %v1979_v24, %v917_v17 }
 0x418   : > { %846 = vadd.xlane.f32.xlu2 %v2042_v37  ;;  %v944_v45 = vor.u32 1.1754944e-38, %v943_v42  ;;  %vm942_vm12 = vcmp.eq.f32.partialorder %v941_v32, 8.507059e+37 }
 0x419   : > { %v921_v41 = vmul.f32 %v1551_v16, %v920_v36  ;;  %1092 = vst [vmem:[%s2017_s22 + $0x20] sm:$0xff] %v1076_v38  ;;  %1132 = vmatmul.f32.gmra.mxu2 %v1076_v38 }
 0x41b   : > { %v922_v31 = vadd.f32 %v1551_v16, %v921_v41  ;;  %v1555_v29 = vpop.eup %1554 }
 0x41c   : > { %v933_v26 = vmul.f32 %v1555_v29, %v829_v18  ;;  %v831_v21 = vpop.xlane.xlu2 %830  ;;  %vm938_vm9 = vweird.f32 %v1555_v29 }
 0x41d   : > { %v926_v20 = vsel %vm925_vm7, %v1551_v16, %v922_v31  ;;  %1556 = vrcp.f32 %v831_v21  ;;  %vm939_vm11 = vmor %vm937_vm10, %vm938_vm9  ;;  %v957_v2 = vand.u32 2147483648, %v831_v21  ;;  %v955_v3 = vand.u32 2147483647, %v831_v21 }
 0x41e   : > { %v931_v24 = vsel %vm928_vm8, %v930_v27, %v926_v20  ;;  %v934_v30 = vsub.f32 1.0, %v933_v26  ;;  %vm951_vm14 = vweird.f32 %v831_v21 }
 0x41f   : > { %v1077_v33 = vmul.f32 %v1989_v28, %v931_v24  ;;  %v958_v23 = vor.u32 1.1754944e-38, %v957_v2  ;;  %vm956_vm0 = vcmp.eq.f32.partialorder %v955_v3, 8.507059e+37 }
 0x420   : > { %v935_v39 = vmul.f32 %v1555_v29, %v934_v30 }
 0x421   : > { %1093 = vst [vmem:[%s2017_s22 + $0x28] sm:$0xff] %v1077_v33  ;;  %1135 = vmatmul.f32.gmra.mxu2 %v1077_v33 }
 0x422   : > { %v936_v44 = vadd.f32 %v1555_v29, %v935_v39 }
 0x423   : > { %v1557_v15 = vpop.eup %1556 }
 0x424   : > { %v947_v46 = vmul.f32 %v1557_v15, %v831_v21  ;;  %v833_v47 = vpop.xlane.xlu0 %832  ;;  %v841_v49 = vpop.xlane.xlu2 %840  ;;  %v940_v50 = vsel %vm939_vm11, %v1555_v29, %v936_v44  ;;  %vm952_vm13 = vweird.f32 %v1557_v15 }
 0x425   : > { %1558 = vrcp.f32 %v833_v47  ;;  %v945_v51 = vsel %vm942_vm12, %v944_v45, %v940_v50  ;;  %vm953_vm15 = vmor %vm951_vm14, %vm952_vm13  ;;  %v971_v10 = vand.u32 2147483648, %v833_v47  ;;  %v1027_v12 = vand.u32 2147483648, %v841_v49 }
 0x426   : > { %v948_v28 = vsub.f32 1.0, %v947_v46  ;;  %1560 = vrcp.f32 %v841_v49  ;;  %v1078_v1 = vmul.f32 %v1994_v43, %v945_v51  ;;  %v969_v14 = vand.u32 2147483647, %v833_v47 }
 0x427   : > { %v1025_v19 = vand.u32 2147483647, %v841_v49  ;;  %vm965_vm3 = vweird.f32 %v833_v47  ;;  %vm1021_vm4 = vweird.f32 %v841_v49  ;;  %v972_v54 = vor.u32 1.1754944e-38, %v971_v10 }
 0x428   : > { %v949_v60 = vmul.f32 %v1557_v15, %v948_v28  ;;  %1094 = vst [vmem:[%s2017_s22 + $0x30] sm:$0xff] %v1078_v1  ;;  %vm970_vm6 = vcmp.eq.f32.partialorder %v969_v14, 8.507059e+37  ;;  %vm1217_vm14 = vcmask 261120  }
 0x429   : > { %1138 = vmatmul.f32.gmra.mxu2 %v1078_v1  ;;  %vm1026_vm8 = vcmp.eq.f32.partialorder %v1025_v19, 8.507059e+37 }
 0x42a   : > { %v950_v4 = vadd.f32 %v1557_v15, %v949_v60 }
 0x42b   : > { %v1559_v25 = vpop.eup %1558 }
 0x42c   : > { %v1561_v59 = vpop.eup %1560  ;;  %v961_v5 = vmul.f32 %v1559_v25, %v833_v47  ;;  %v843_v6 = vpop.xlane.xlu2 %842  ;;  %v954_v58 = vsel %vm953_vm15, %v1557_v15, %v950_v4  ;;  %vm966_vm1 = vweird.f32 %v1559_v25 }
 0x42d   : > { %v1017_v7 = vmul.f32 %v1561_v59, %v841_v49  ;;  %1562 = vrcp.f32 %v843_v6  ;;  %v959_v43 = vsel %vm956_vm0, %v958_v23, %v954_v58  ;;  %vm1022_vm2 = vweird.f32 %v1561_v59  ;;  %vm967_vm5 = vmor %vm965_vm3, %vm966_vm1 }
 0x42e   : > { %v962_v8 = vsub.f32 1.0, %v961_v5  ;;  %v1079_v52 = vmul.f32 %v1999_v48, %v959_v43  ;;  %v1028_v48 = vor.u32 1.1754944e-38, %v1027_v12  ;;  %vm1023_vm7 = vmor %vm1021_vm4, %vm1022_vm2  ;;  %v1041_v31 = vand.u32 2147483648, %v843_v6 }
 0x42f   : > { %v1018_v57 = vsub.f32 1.0, %v1017_v7  ;;  %v1039_v27 = vand.u32 2147483647, %v843_v6  ;;  %vm1035_vm10 = vweird.f32 %v843_v6 }
 0x430   : > { %v963_v11 = vmul.f32 %v1559_v25, %v962_v8  ;;  %1095 = vst [vmem:[%s2017_s22 + $0x38] sm:$0xff] %v1079_v52  ;;  %v1042_v21 = vor.u32 1.1754944e-38, %v1041_v31 }
 0x431   : > { %v1019_v55 = vmul.f32 %v1561_v59, %v1018_v57  ;;  %1141 = vmatmul.f32.gmra.mxu2 %v1079_v52  ;;  %vm1040_vm12 = vcmp.eq.f32.partialorder %v1039_v27, 8.507059e+37 }
 0x432   : > { %v964_v16 = vadd.f32 %v1559_v25, %v963_v11 }
 0x433   : > { %v1563_v53 = vpop.eup %1562  ;;  %v1020_v40 = vadd.f32 %v1561_v59, %v1019_v55 }
 0x434   : > { %v1031_v18 = vmul.f32 %v1563_v53, %v843_v6  ;;  %v968_v35 = vsel %vm967_vm5, %v1559_v25, %v964_v16  ;;  %vm1036_vm9 = vweird.f32 %v1563_v53 }
 0x435   : > { %v973_v36 = vsel %vm970_vm6, %v972_v54, %v968_v35  ;;  %v1024_v17 = vsel %vm1023_vm7, %v1561_v59, %v1020_v40  ;;  %vm1037_vm11 = vmor %vm1035_vm10, %vm1036_vm9 }
 0x436   : > { %v1032_v38 = vsub.f32 1.0, %v1031_v18  ;;  %v1080_v56 = vmul.f32 %v2005_v63, %v973_v36  ;;  %v1029_v41 = vsel %vm1026_vm8, %v1028_v48, %v1024_v17 }
 0x437   : > { %v1084_v34 = vmul.f32 %v2003_v61, %v1029_v41 }
 0x438   : > { %v1033_v29 = vmul.f32 %v1563_v53, %v1032_v38  ;;  %1096 = vst [vmem:[%s2017_s22 + $0x40] sm:$0xff] %v1080_v56 }
 0x439   : > { %1144 = vmatmul.f32.gmra.mxu2 %v1080_v56  ;;  %1100 = vst [vmem:[%s2017_s22 + $0x60] sm:$0xff] %v1084_v34  ;;  %1156 = vmatmul.f32.vlgmr.msrb.gmra.mxu3 %v1084_v34 }
 0x43a   : > { %v1034_v26 = vadd.f32 %v1563_v53, %v1033_v29 }
 0x43c   : > { %v1038_v20 = vsel %vm1037_vm11, %v1563_v53, %v1034_v26 }
 0x43d   : > { %v1043_v63 = vsel %vm1040_vm12, %v1042_v21, %v1038_v20 }
 0x43e   : > { %v1085_v24 = vmul.f32 %v2009_v62, %v1043_v63 }
 0x440   : > { %1101 = vst [vmem:[%s2017_s22 + $0x68] sm:$0xff] %v1085_v24 }
 0x441   : > { %1159 = vmatmul.f32.gmra.mxu3 %v1085_v24 }
 0x473   : > { %v835_v61 = vpop.xlane.xlu0 %834 }
 0x474   : > { %1564 = vrcp.f32 %v835_v61  ;;  %v985_v15 = vand.u32 2147483648, %v835_v61  ;;  %v983_v46 = vand.u32 2147483647, %v835_v61  ;;  %vm979_vm0 = vweird.f32 %v835_v61 }
 0x476   : > { %v986_v50 = vor.u32 1.1754944e-38, %v985_v15  ;;  %vm984_vm2 = vcmp.eq.f32.partialorder %v983_v46, 8.507059e+37 }
 0x47a   : > { %v1565_v30 = vpop.eup %1564 }
 0x47b   : > { %v975_v33 = vmul.f32 %v1565_v30, %v835_v61  ;;  %v837_v42 = vpop.xlane.xlu0 %836  ;;  %v1121_v39 = vpop.f32.mrf.mxu2  ;;  %vm980_vm15 = vweird.f32 %v1565_v30 }
 0x47c   : > { %1566 = vrcp.f32 %v837_v42  ;;  %vm1169_vm13 = vcmp.gt.f32.partialorder %v1121_v39, 0.0  ;;  %v1185_v32 = vmul.f32 0.2, %v1121_v39  ;;  %vm981_vm1 = vmor %vm979_vm0, %vm980_vm15  ;;  %v997_v6 = vand.u32 2147483647, %v837_v42 }
 0x47d   : > { %v976_v62 = vsub.f32 1.0, %v975_v33  ;;  %v999_v58 = vand.u32 2147483648, %v837_v42  ;;  %vm993_vm5 = vweird.f32 %v837_v42 }
 0x47e   : > { %v1201_v44 = vsel %vm1169_vm13, %v1121_v39, %v1185_v32  ;;  %vm998_vm7 = vcmp.eq.f32.partialorder %v997_v6, 8.507059e+37 }
 0x47f   : > { %v977_v45 = vmul.f32 %v1565_v30, %v976_v62  ;;  %1218 = vst.msk [vmem:[%s2064_s28] sm:$0xff] %vm1217_vm14, %v1201_v44  ;;  %v1000_v14 = vor.u32 1.1754944e-38, %v999_v58 }
 0x481   : > { %v978_v47 = vadd.f32 %v1565_v30, %v977_v45 }
 0x482   : > { %v1567_v49 = vpop.eup %1566 }
 0x483   : > { %v989_v51 = vmul.f32 %v1567_v49, %v837_v42  ;;  %v2068_v28 = vpop.xlane.xlu2 %844  ;;  %v1124_v1 = vpop.f32.mrf.mxu2  ;;  %v982_v2 = vsel %vm981_vm1, %v1565_v30, %v978_v47  ;;  %vm994_vm4 = vweird.f32 %v1567_v49 }
 0x484   : > { %v839_v60 = vpop.xlane.xlu0 %838  ;;  %1568 = vrcp.f32 %v2068_v28  ;;  %vm1170_vm3 = vcmp.gt.f32.partialorder %v1124_v1, 0.0  ;;  %v1186_v3 = vmul.f32 0.2, %v1124_v1  ;;  %v987_v4 = vsel %vm984_vm2, %v986_v50, %v982_v2  ;;  %vm2075_vm6 = vmor %vm993_vm5, %vm994_vm4 }
 0x485   : > { %v990_v25 = vsub.f32 1.0, %v989_v51  ;;  %1570 = vrcp.f32 %v839_v60  ;;  %v1081_v59 = vmul.f32 %v2022_v22, %v987_v4  ;;  %v1013_v55 = vand.u32 2147483648, %v839_v60 }
 0x486   : > { %v1202_v23 = vsel %vm1170_vm3, %v1124_v1, %v1186_v3  ;;  %v1053_v40 = vand.u32 2147483647, %v2068_v28  ;;  %v1055_v48 = vand.u32 2147483648, %v2068_v28  ;;  %v1011_v38 = vand.u32 2147483647, %v839_v60 }
 0x487   : > { %v991_v5 = vmul.f32 %v1567_v49, %v990_v25  ;;  %1219 = vst.msk [vmem:[%s2064_s28 + $0x8] sm:$0xff] %vm1217_vm14, %v1202_v23  ;;  %1147 = vmatmul.f32.gmra.mxu2 %v1081_v59  ;;  %vm1049_vm11 = vweird.f32 %v2068_v28  ;;  %vm1007_vm12 = vweird.f32 %v839_v60  ;;  %v1014_v29 = vor.u32 1.1754944e-38, %v1013_v55 }
 0x488   : > { %1097 = vst [vmem:[%s2017_s22 + $0x48] sm:$0xff] %v1081_v59  ;;  %v1056_v31 = vor.u32 1.1754944e-38, %v1055_v48  ;;  %vm1054_vm0 = vcmp.eq.f32.partialorder %v1053_v40, 8.507059e+37  ;;  %vm1012_vm1 = vcmp.eq.f32.partialorder %v1011_v38, 8.507059e+37 }
 0x489   : > { %v992_v7 = vadd.f32 %v1567_v49, %v991_v5 }
 0x48a   : > { %v1569_v43 = vpop.eup %1568 }
 0x48b   : > { %v1571_v52 = vpop.eup %1570  ;;  %v1045_v57 = vmul.f32 %v1569_v43, %v2068_v28  ;;  %v2080_v10 = vpop.xlane.xlu2 %846  ;;  %v996_v22 = vsel %vm2075_vm6, %v1567_v49, %v992_v7  ;;  %vm1050_vm9 = vweird.f32 %v1569_v43 }
 0x48c   : > { %v1003_v11 = vmul.f32 %v1571_v52, %v839_v60  ;;  %1572 = vrcp.f32 %v2080_v10  ;;  %v1127_v12 = vpop.f32.mrf.mxu2  ;;  %v1001_v54 = vsel %vm998_vm7, %v1000_v14, %v996_v22  ;;  %vm1008_vm10 = vweird.f32 %v1571_v52  ;;  %vm1051_vm13 = vmor %vm1049_vm11, %vm1050_vm9 }
 0x48d   : > { %v1046_v19 = vsub.f32 1.0, %v1045_v57  ;;  %vm1171_vm8 = vcmp.gt.f32.partialorder %v1127_v12, 0.0  ;;  %v1187_v16 = vmul.f32 0.2, %v1127_v12  ;;  %v1082_v36 = vmul.f32 %v2028_v0, %v1001_v54  ;;  %vm1009_vm15 = vmor %vm1007_vm12, %vm1008_vm10 }
 0x48e   : > { %v1004_v53 = vsub.f32 1.0, %v1003_v11  ;;  %v1069_v30 = vand.u32 2147483648, %v2080_v10  ;;  %v1067_v62 = vand.u32 2147483647, %v2080_v10  ;;  %vm1063_vm4 = vweird.f32 %v2080_v10 }
 0x48f   : > { %v1047_v18 = vmul.f32 %v1569_v43, %v1046_v19  ;;  %v1203_v35 = vsel %vm1171_vm8, %v1127_v12, %v1187_v16  ;;  %1098 = vst [vmem:[%s2017_s22 + $0x50] sm:$0xff] %v1082_v36  ;;  %1150 = vmatmul.f32.gmra.mxu2 %v1082_v36 }
 0x490   : > { %v1005_v17 = vmul.f32 %v1571_v52, %v1004_v53  ;;  %1220 = vst.msk [vmem:[%s2064_s28 + $0x10] sm:$0xff] %vm1217_vm14, %v1203_v35  ;;  %v1070_v15 = vor.u32 1.1754944e-38, %v1069_v30  ;;  %vm1068_vm6 = vcmp.eq.f32.partialorder %v1067_v62, 8.507059e+37 }
 0x491   : > { %v1048_v56 = vadd.f32 %v1569_v43, %v1047_v18 }
 0x492   : > { %v1573_v41 = vpop.eup %1572  ;;  %v1006_v34 = vadd.f32 %v1571_v52, %v1005_v17 }
 0x493   : > { %v1059_v0 = vmul.f32 %v1573_v41, %v2080_v10  ;;  %v1052_v27 = vsel %vm1051_vm13, %v1569_v43, %v1048_v56  ;;  %vm1064_vm3 = vweird.f32 %v1573_v41 }
 0x494   : > { %v1130_v26 = vpop.f32.mrf.mxu2  ;;  %v1010_v21 = vsel %vm1009_vm15, %v1571_v52, %v1006_v34  ;;  %v1057_v20 = vsel %vm1054_vm0, %v1056_v31, %v1052_v27  ;;  %vm1065_vm5 = vmor %vm1063_vm4, %vm1064_vm3 }
 0x495   : > { %v1060_v63 = vsub.f32 1.0, %v1059_v0  ;;  %vm1172_vm2 = vcmp.gt.f32.partialorder %v1130_v26, 0.0  ;;  %v1188_v24 = vmul.f32 0.2, %v1130_v26  ;;  %v1015_v61 = vsel %vm1012_vm1, %v1014_v29, %v1010_v21 }
 0x496   : > { %v1083_v33 = vmul.f32 %v2037_v13, %v1015_v61  ;;  %v1086_v42 = vmul.f32 %v2034_v9, %v1057_v20 }
 0x497   : > { %v1061_v39 = vmul.f32 %v1573_v41, %v1060_v63  ;;  %v1204_v32 = vsel %vm1172_vm2, %v1130_v26, %v1188_v24 }
 0x498   : > { %1221 = vst.msk [vmem:[%s2064_s28 + $0x18] sm:$0xff] %vm1217_vm14, %v1204_v32  ;;  %1162 = vmatmul.f32.gmra.mxu3 %v1086_v42  ;;  %1153 = vmatmul.f32.gmra.mxu2 %v1083_v33 }
 0x499   : > { %1099 = vst [vmem:[%s2017_s22 + $0x58] sm:$0xff] %v1083_v33  ;;  %v1062_v44 = vadd.f32 %v1573_v41, %v1061_v39 }
 0x49a   : > { %1102 = vst [vmem:[%s2017_s22 + $0x70] sm:$0xff] %v1086_v42 }
 0x49b   : > { %v1066_v9 = vsel %vm1065_vm5, %v1573_v41, %v1062_v44 }
 0x49c   : > { %v1133_v13 = vpop.f32.mrf.mxu2  ;;  %v1071_v45 = vsel %vm1068_vm6, %v1070_v15, %v1066_v9 }
 0x49d   : > { %vm1173_vm7 = vcmp.gt.f32.partialorder %v1133_v13, 0.0  ;;  %v1189_v46 = vmul.f32 0.2, %v1133_v13  ;;  %v1087_v47 = vmul.f32 %v2042_v37, %v1071_v45 }
 0x49f   : > { %v1205_v49 = vsel %vm1173_vm7, %v1133_v13, %v1189_v46  ;;  %1103 = vst [vmem:[%s2017_s22 + $0x78] sm:$0xff] %v1087_v47 }
 0x4a0   : > { %1222 = vst.msk [vmem:[%s2064_s28 + $0x20] sm:$0xff] %vm1217_vm14, %v1205_v49  ;;  %1165 = vmatmul.f32.gmra.mxu3 %v1087_v47 }
 0x4a4   : > { %v1136_v50 = vpop.f32.mrf.mxu2 }
 0x4a5   : > { %vm1174_vm8 = vcmp.gt.f32.partialorder %v1136_v50, 0.0  ;;  %v1190_v51 = vmul.f32 0.2, %v1136_v50 }
 0x4a7   : > { %v1206_v28 = vsel %vm1174_vm8, %v1136_v50, %v1190_v51 }
 0x4a8   : > { %1223 = vst.msk [vmem:[%s2064_s28 + $0x28] sm:$0xff] %vm1217_vm14, %v1206_v28 }
 0x4a9   : > { %1601 = shalt.err (!%p1598_p3)
}
 0x4aa   : > { %s1640_s14 = smov 128   ;;  %s1641_s23 = smov 8  }
 0x4ab   : > { %1462 = dma.vmem_to_hbm [thread:$0]  (%p1705_p5), %s1257_s7, 2048, %s1259_s8, %s1240_s9, %s1640_s14, %s1640_s14, %s1641_s23  }
 0x4ac   : > { %v1139_v37 = vpop.f32.mrf.mxu2 }
 0x4ad   : > { %vm1175_vm9 = vcmp.gt.f32.partialorder %v1139_v37, 0.0  ;;  %v1191_v1 = vmul.f32 0.2, %v1139_v37 }
 0x4af   : > { %v1207_v2 = vsel %vm1175_vm9, %v1139_v37, %v1191_v1 }
 0x4b0   : > { %1224 = vst.msk [vmem:[%s2064_s28 + $0x30] sm:$0xff] %vm1217_vm14, %v1207_v2 }
 0x4b4   : > { %v1142_v60 = vpop.f32.mrf.mxu2 }
 0x4b5   : > { %vm1176_vm10 = vcmp.gt.f32.partialorder %v1142_v60, 0.0  ;;  %v1192_v3 = vmul.f32 0.2, %v1142_v60 }
 0x4b7   : > { %v1208_v4 = vsel %vm1176_vm10, %v1142_v60, %v1192_v3 }
 0x4b8   : > { %1225 = vst.msk [vmem:[%s2064_s28 + $0x38] sm:$0xff] %vm1217_vm14, %v1208_v4 }
 0x4bc   : > { %v1145_v25 = vpop.f32.mrf.mxu2  ;;  %v1157_v23 = vpop.f32.mrf.mxu3 }
 0x4bd   : > { %vm1177_vm11 = vcmp.gt.f32.partialorder %v1145_v25, 0.0  ;;  %v1193_v59 = vmul.f32 0.2, %v1145_v25  ;;  %vm1181_vm12 = vcmp.gt.f32.partialorder %v1157_v23, 0.0  ;;  %v1197_v5 = vmul.f32 0.2, %v1157_v23 }
 0x4bf   : > { %v1209_v6 = vsel %vm1177_vm11, %v1145_v25, %v1193_v59  ;;  %v1213_v58 = vsel %vm1181_vm12, %v1157_v23, %v1197_v5 }
 0x4c0   : > { %1226 = vst.msk [vmem:[%s2064_s28 + $0x40] sm:$0xff] %vm1217_vm14, %v1209_v6 }
 0x4c1   : > { %1230 = vst.msk [vmem:[%s2064_s28 + $0x60] sm:$0xff] %vm1217_vm14, %v1213_v58 }
 0x4c4   : > { %v1160_v7 = vpop.f32.mrf.mxu3 }
 0x4c5   : > { %vm1182_vm13 = vcmp.gt.f32.partialorder %v1160_v7, 0.0  ;;  %v1198_v43 = vmul.f32 0.2, %v1160_v7 }
 0x4c7   : > { %v1214_v8 = vsel %vm1182_vm13, %v1160_v7, %v1198_v43 }
 0x4c8   : > { %1231 = vst.msk [vmem:[%s2064_s28 + $0x68] sm:$0xff] %vm1217_vm14, %v1214_v8 }
 0x50a   : > { %v1148_v52 = vpop.f32.mrf.mxu2 }
 0x50b   : > { %vm1178_vm15 = vcmp.gt.f32.partialorder %v1148_v52, 0.0  ;;  %v1194_v57 = vmul.f32 0.2, %v1148_v52 }
 0x50d   : > { %v1210_v10 = vsel %vm1178_vm15, %v1148_v52, %v1194_v57 }
 0x50e   : > { %1227 = vst.msk [vmem:[%s2064_s28 + $0x48] sm:$0xff] %vm1217_vm14, %v1210_v10 }
 0x512   : > { %v1151_v22 = vpop.f32.mrf.mxu2 }
 0x513   : > { %vm1179_vm0 = vcmp.gt.f32.partialorder %v1151_v22, 0.0  ;;  %v1195_v11 = vmul.f32 0.2, %v1151_v22 }
 0x515   : > { %v1211_v12 = vsel %vm1179_vm0, %v1151_v22, %v1195_v11 }
 0x516   : > { %1228 = vst.msk [vmem:[%s2064_s28 + $0x50] sm:$0xff] %vm1217_vm14, %v1211_v12 }
 0x51b   : > { %v1163_v14 = vpop.f32.mrf.mxu3  ;;  %v1154_v55 = vpop.f32.mrf.mxu2 }
 0x51c   : > { %vm1183_vm1 = vcmp.gt.f32.partialorder %v1163_v14, 0.0  ;;  %v1199_v19 = vmul.f32 0.2, %v1163_v14  ;;  %vm1180_vm2 = vcmp.gt.f32.partialorder %v1154_v55, 0.0  ;;  %v1196_v16 = vmul.f32 0.2, %v1154_v55 }
 0x51e   : > { %v1215_v53 = vsel %vm1183_vm1, %v1163_v14, %v1199_v19  ;;  %v1212_v54 = vsel %vm1180_vm2, %v1154_v55, %v1196_v16 }
 0x51f   : > { %1232 = vst.msk [vmem:[%s2064_s28 + $0x70] sm:$0xff] %vm1217_vm14, %v1215_v53 }
 0x520   : > { %1229 = vst.msk [vmem:[%s2064_s28 + $0x58] sm:$0xff] %vm1217_vm14, %v1212_v54 }
 0x523   : > { %v1166_v40 = vpop.f32.mrf.mxu3 }
 0x524   : > { %vm1184_vm3 = vcmp.gt.f32.partialorder %v1166_v40, 0.0  ;;  %v1200_v48 = vmul.f32 0.2, %v1166_v40 }
 0x526   : > { %v1216_v18 = vsel %vm1184_vm3, %v1166_v40, %v1200_v48 }
 0x527   : > { %1233 = vst.msk [vmem:[%s2064_s28 + $0x78] sm:$0xff] %vm1217_vm14, %v1216_v18 }
 0x528 PF: > { %p1468_p4 = scmp.ge.s32.totalorder %s1636_s18, 2  ;;  %s1281_s25 = sand.u32 1, %s1624_s15  }
 0x529   : > { %s1282_s27 = scalar_lea.sflag [#allocation3], %s1281_s25 }
 0x52a   : > { %p1465_p5 = pnand %p1468_p4, %p1709_p6 }
 0x52c   : > { %p1466_p7 = pneg %p1465_p5 }
 0x52e   : > { %1619 = dma.done.wait (%p1466_p7), %s1282_s27, 2048  }
 0x52f   : > { %1621 = vsyncadd (%p1466_p7), %s1282_s27, 4294965248  ;;  %p15_p8 = scmp.ge.s32.totalorder %s1692_s21, 4   ;;  %s2171_s15 = smov %s1628_s16 }
 0x530   : > { %s2172_s16 = smov %s1632_s17  ;;  %s2173_s17 = smov %s1703_s24 }
 0x531   : > { %s2174_s18 = smov %s1692_s21  ;;  %17 = sbr.rel (!%p15_p8) target bundleno = 3 (0x3), region = 82 }
 0x536   :  { %1288 = vsyncpa [#allocation3], 1 }
 0x537   :  { %1290 = vsyncpa [#allocation3 + $0x1], 1 }

</bundles_post_ra>
